<compile_context>
chip_gen: v7x
topology: tpu7x:2x2x1
jax: 0.10.0
libtpu: 0.0.40
codegen_flags: <defaults>
</compile_context>

<pallas_src>
import jax
import jax.numpy as jnp
from jax.experimental import pallas as pl
from jax.experimental.pallas import tpu as pltpu


def _round_up(x, m):
    return ((x + m - 1) // m) * m


def _make_flow_kernel(num_flows):
    """Build the kernel for a chain of `num_flows` planar flows (K is static)."""

    def kernel(z_ref, w_ref, u_ref, g_ref, b_ref, wu_ref, z_out_ref, ld_ref):
        """One grid step = one batch tile; the whole K-flow chain runs in-kernel.

        z_ref    : (TB, Dp)    VMEM - z0 tile (native dtype, aliased with z_out in HBM)
        w_ref    : (Kp, Dp)    VMEM - stacked w_k (resident, f32)
        u_ref    : (Kp, Dp)    VMEM - stacked u_k (resident, rows >= K zero)
        g_ref    : (Kp, Kp)    VMEM - strictly-upper Gram matrix G[j,k] = u_j.w_k (k>j)
        b_ref    : (1, Kp)     VMEM - biases (zero in padding)
        wu_ref   : (1, Kp)     VMEM - w_k.u_k (zero in padding)
        z_out_ref: (TB, Dp)    VMEM - final z tile (written once)
        ld_ref   : (1, 8, TB)  VMEM - log|det J| per row, lane-dense, sublane-replicated
        """
        f32 = jnp.float32
        hi = jax.lax.Precision.HIGHEST
        kp = w_ref.shape[0]

        z0 = z_ref[...].astype(f32)                          # (TB, Dp)

        # a[:, k] carries a_k = z_k . w_k + b_k via the affine recurrence
        #   a_k = z0 . w_k + b_k + sum_{j<k} h_j (u_j . w_k)
        # One MXU matmul replaces K per-flow VPU dot products + XLU reduces.
        a = jnp.einsum("td,kd->tk", z0, w_ref[...],
                       preferred_element_type=f32, precision=hi) + b_ref[...]

        g_mat = g_ref[...]                                   # (Kp, Kp)
        lane = jax.lax.broadcasted_iota(jnp.int32, (1, kp), 1)

        # Sequential part of the recurrence (K small, static Python unroll).
        # Column k is isolated with a one-hot lane mask (no unaligned lane
        # slices) and the rank-1 update  A += h_k (x) G[k, :]  is expressed as
        # (tanh(A) * e_k) @ G  — a tiny MXU matmul.  Row k of G is zero for
        # columns <= k, so already-finalized columns of A never change.
        for k in range(num_flows):
            e_k = (lane == k).astype(f32)                    # (1, Kp) one-hot
            h_k = jnp.tanh(a) * e_k                          # only column k survives
            a = a + jnp.dot(h_k, g_mat,
                            preferred_element_type=f32, precision=hi)

        h = jnp.tanh(a)                                      # (TB, Kp) all h_k, batched EUP

        # z_K = z0 + sum_k h_k u_k  ->  second MXU matmul (TB,Kp)x(Kp,Dp).
        z_new = z0 + jnp.dot(h, u_ref[...],
                             preferred_element_type=f32, precision=hi)
        z_out_ref[...] = z_new.astype(z_out_ref.dtype)

        # log|det J| = sum_k log|1 + (1 - h_k^2)(w_k . u_k)|, one batched log
        # (padded columns have wu = 0 -> contribute log|1| = 0).
        logs = jnp.log(jnp.abs(1.0 + (1.0 - h * h) * wu_ref[...]))   # (TB, Kp)
        # Reduce over k AND transpose/replicate to a lane-dense (8, TB) slab in
        # a single MXU op: ld_rep[s, t] = sum_k logs[t, k].  Avoids a narrow
        # (TB, 1) masked-store output path.
        ones8 = jnp.ones((8, kp), f32)
        ld_rep = jnp.einsum("sk,tk->st", ones8, logs,
                            preferred_element_type=f32, precision=hi)  # (8, TB)
        ld_ref[0, :, :] = ld_rep

    return kernel


@jax.jit
def normalizing_flow_forward(z, W, U, b):
    """Apply K planar flows sequentially; returns (z_K, log_det[batch])."""
    B, D = z.shape
    K = W.shape[0]

    Dp = _round_up(max(D, 1), 128)          # lane-dense features
    Kp = _round_up(max(K, 1), 128)          # lane-dense flow axis
    B8 = _round_up(max(B, 1), 8)

    # ---- batch-tile size from a VMEM budget (v5e's 16 MiB scoped default is
    #      the tightest), plus >= 2 grid steps when possible so both of v7x's
    #      TensorCores get work. ----
    z_bytes = jnp.dtype(z.dtype).itemsize
    fixed = 8 * (2 * Kp * Dp + Kp * Kp + 2 * Kp) + 4 * Kp * Kp   # resident params (+G copy)
    per_row = (4 * z_bytes * Dp       # z in/out, double-buffered
               + 8 * Dp               # f32 z0 / z_new temporaries
               + 16 * Kp              # a / h / logs / masked-h temporaries
               + 64)                  # ld output
    budget = 12 * 1024 * 1024
    tb_cap = max(8, (budget - fixed) // per_row)
    tb_cap = max(8, min((int(tb_cap) // 8) * 8, 1024))

    n_tiles = max(1, -(-B8 // tb_cap))
    if B8 >= 16:
        n_tiles = max(n_tiles, 2)     # keep both v7x TensorCores busy
    TB = _round_up(-(-B8 // n_tiles), 8)
    Bp = _round_up(B8, TB)
    n_tiles = Bp // TB

    f32 = jnp.float32
    Wf = W.astype(f32)
    Uf = U.astype(f32)
    bf = b.astype(f32).reshape(K)

    # z streams in its native dtype (no wrapper upcast -> half the HBM traffic
    # for bf16 inputs); zero padding leaves the math unchanged.
    z_pad = jnp.pad(z, ((0, Bp - B), (0, Dp - D)))
    w_pad = jnp.pad(Wf, ((0, Kp - K), (0, Dp - D)))              # (Kp, Dp)
    u_pad = jnp.pad(Uf, ((0, Kp - K), (0, Dp - D)))              # (Kp, Dp)

    # Strictly-upper Gram matrix G[j, k] = u_j . w_k for k > j, zero elsewhere.
    gram = jnp.einsum("jd,kd->jk", Uf, Wf, precision=jax.lax.Precision.HIGHEST)
    gram = jnp.where(jnp.triu(jnp.ones((K, K), dtype=bool), k=1), gram, 0.0)
    g_pad = jnp.pad(gram, ((0, Kp - K), (0, Kp - K)))            # (Kp, Kp)

    b_row = jnp.pad(bf.reshape(1, K), ((0, 0), (0, Kp - K)))     # (1, Kp)
    wu_row = jnp.pad(jnp.sum(Wf * Uf, axis=-1).reshape(1, K),
                     ((0, 0), (0, Kp - K)))                      # (1, Kp)

    kernel = _make_flow_kernel(K)

    z_out, ld = pl.pallas_call(
        kernel,
        out_shape=(
            jax.ShapeDtypeStruct((Bp, Dp), z.dtype),
            jax.ShapeDtypeStruct((n_tiles, 8, TB), jnp.float32),
        ),
        grid_spec=pltpu.PrefetchScalarGridSpec(
            num_scalar_prefetch=0,
            grid=(n_tiles,),
            in_specs=[
                pl.BlockSpec((TB, Dp), lambda i: (i, 0)),        # z tile
                pl.BlockSpec((Kp, Dp), lambda i: (0, 0)),        # W (resident)
                pl.BlockSpec((Kp, Dp), lambda i: (0, 0)),        # U (resident)
                pl.BlockSpec((Kp, Kp), lambda i: (0, 0)),        # G (resident)
                pl.BlockSpec((1, Kp), lambda i: (0, 0)),         # b
                pl.BlockSpec((1, Kp), lambda i: (0, 0)),         # w.u
            ],
            out_specs=[
                pl.BlockSpec((TB, Dp), lambda i: (i, 0)),        # z_out
                pl.BlockSpec((1, 8, TB), lambda i: (i, 0, 0)),   # log_det (lane-dense)
            ],
        ),
        compiler_params=pltpu.CompilerParams(
            dimension_semantics=("parallel",)),
        input_output_aliases={0: 0},                             # z_pad -> z_out (HBM)
    )(z_pad, w_pad, u_pad, g_pad, b_row, wu_row)

    log_det = ld[:, 0, :].reshape(Bp)[:B]
    return z_out[:B, :D], log_det


def _reference(z, W, U, b):
    """Pure-JAX reference mirroring NormalizingFlow.forward semantics (exact f32)."""
    B = z.shape[0]
    z = z.astype(jnp.float32)
    log_det = jnp.zeros((B,), jnp.float32)
    for k in range(W.shape[0]):
        w, u, bk = W[k].astype(jnp.float32), U[k].astype(jnp.float32), b[k]
        a = jnp.sum(z * w[None, :], axis=-1) + bk
        h = jnp.tanh(a)
        z = z + h[:, None] * u[None, :]
        wu = jnp.sum(w * u)
        log_det = log_det + jnp.log(jnp.abs(1.0 + (1.0 - h * h) * wu))
    return z, log_det


if __name__ == "__main__":
    B, D, K = 8, 32, 4   # batch, feature dim, number of flows in the chain

    key = jax.random.PRNGKey(0)
    kz, kw, ku, kb = jax.random.split(key, 4)
    z = jax.random.normal(kz, (B, D), dtype=jnp.float32)
    # Deterministic small-scale flow parameters (synthetic, no checkpoint).
    W = 0.1 * jax.random.normal(kw, (K, D), dtype=jnp.float32)
    U = 0.1 * jax.random.normal(ku, (K, D), dtype=jnp.float32)
    b = 0.1 * jax.random.normal(kb, (K,), dtype=jnp.float32)

    z_out, log_det = normalizing_flow_forward(z, W, U, b)
    jax.block_until_ready((z_out, log_det))

    z_ref, ld_ref = _reference(z, W, U, b)
    assert z_out.shape == (B, D) and log_det.shape == (B,)
    assert jnp.allclose(z_out, z_ref, atol=1e-4, rtol=1e-4)
    assert jnp.allclose(log_det, ld_ref, atol=1e-4, rtol=1e-4)

    print("KERNEL_OK")
</pallas_src>

<mosaic_0001>
module attributes {stable_mosaic.version = 11 : i64} {
  func.func @kernel(%arg0: i32, %arg1: memref<8x128xf32, #tpu.memory_space<vmem>>, %arg2: memref<128x128xf32, #tpu.memory_space<vmem>>, %arg3: memref<128x128xf32, #tpu.memory_space<vmem>>, %arg4: memref<128x128xf32, #tpu.memory_space<vmem>>, %arg5: memref<1x128xf32, #tpu.memory_space<vmem>>, %arg6: memref<1x128xf32, #tpu.memory_space<vmem>>, %arg7: memref<8x128xf32, #tpu.memory_space<vmem>>, %arg8: memref<1x8x8xf32, #tpu.memory_space<vmem>>) attributes {dimension_semantics = [#tpu.dimension_semantics<parallel>], iteration_bounds = array<i64: 1>, scalar_prefetch = 0 : i64, scratch_operands = 0 : i64, tpu.core_type = #tpu.core_type<tc>, window_params = [{transform_indices = @transform_0, window_bounds = array<i64: 8, 128>}, {pipeline_mode = #tpu.pipeline_mode<synchronous>, transform_indices = @transform_1, window_bounds = array<i64: 128, 128>}, {pipeline_mode = #tpu.pipeline_mode<synchronous>, transform_indices = @transform_2, window_bounds = array<i64: 128, 128>}, {pipeline_mode = #tpu.pipeline_mode<synchronous>, transform_indices = @transform_3, window_bounds = array<i64: 128, 128>}, {pipeline_mode = #tpu.pipeline_mode<synchronous>, transform_indices = @transform_4, window_bounds = array<i64: 1, 128>}, {pipeline_mode = #tpu.pipeline_mode<synchronous>, transform_indices = @transform_5, window_bounds = array<i64: 1, 128>}, {transform_indices = @transform_6, window_bounds = array<i64: 8, 128>}, {transform_indices = @transform_7, window_bounds = array<i64: 1, 8, 8>}]} {
    %c0 = arith.constant 0 : index
    %c0_0 = arith.constant 0 : index
    %0 = vector.load %arg1[%c0, %c0_0] : memref<8x128xf32, #tpu.memory_space<vmem>>, vector<8x128xf32>
    %c0_1 = arith.constant 0 : index
    %c0_2 = arith.constant 0 : index
    %1 = vector.load %arg2[%c0_1, %c0_2] : memref<128x128xf32, #tpu.memory_space<vmem>>, vector<128x128xf32>
    "tpu.trace_start"() <{level = 10 : i32, message = "td,kd->tk"}> : () -> ()
    %cst = arith.constant dense<0.000000e+00> : vector<8x128xf32>
    %2 = tpu.matmul %0, %1, %cst {dimension_numbers = #tpu.dot_dimension_numbers<[1], [1], [0], [0], [0, 0, 1, 0], [], []>, precision = #tpu.contract_precision<fp32>} : vector<8x128xf32>, vector<128x128xf32>, vector<8x128xf32> -> vector<8x128xf32>
    "tpu.trace_stop"() : () -> ()
    %c0_3 = arith.constant 0 : index
    %c0_4 = arith.constant 0 : index
    %3 = vector.load %arg5[%c0_3, %c0_4] : memref<1x128xf32, #tpu.memory_space<vmem>>, vector<1x128xf32>
    %4 = vector.broadcast %3 : vector<1x128xf32> to vector<8x128xf32>
    %5 = arith.addf %2, %4 : vector<8x128xf32>
    %c0_5 = arith.constant 0 : index
    %c0_6 = arith.constant 0 : index
    %6 = vector.load %arg4[%c0_5, %c0_6] : memref<128x128xf32, #tpu.memory_space<vmem>>, vector<128x128xf32>
    %7 = tpu.iota {dimensions = array<i32: 1>} : vector<1x128xi32>
    %c0_i32 = arith.constant 0 : i32
    %8 = vector.broadcast %c0_i32 : i32 to vector<1x128xi32>
    %9 = arith.cmpi eq, %7, %8 : vector<1x128xi32>
    %10 = arith.extui %9 : vector<1x128xi1> to vector<1x128xi32>
    %11 = arith.sitofp %10 : vector<1x128xi32> to vector<1x128xf32>
    %12 = math.tanh %5 : vector<8x128xf32>
    %13 = vector.broadcast %11 : vector<1x128xf32> to vector<8x128xf32>
    %14 = arith.mulf %12, %13 : vector<8x128xf32>
    %cst_7 = arith.constant dense<0.000000e+00> : vector<8x128xf32>
    %15 = tpu.matmul %14, %6, %cst_7 {dimension_numbers = #tpu.dot_dimension_numbers<[1], [0], [0], [1], [0, 0, 1, 1], [], []>, precision = #tpu.contract_precision<fp32>} : vector<8x128xf32>, vector<128x128xf32>, vector<8x128xf32> -> vector<8x128xf32>
    %16 = arith.addf %5, %15 : vector<8x128xf32>
    %c1_i32 = arith.constant 1 : i32
    %17 = vector.broadcast %c1_i32 : i32 to vector<1x128xi32>
    %18 = arith.cmpi eq, %7, %17 : vector<1x128xi32>
    %19 = arith.extui %18 : vector<1x128xi1> to vector<1x128xi32>
    %20 = arith.sitofp %19 : vector<1x128xi32> to vector<1x128xf32>
    %21 = math.tanh %16 : vector<8x128xf32>
    %22 = vector.broadcast %20 : vector<1x128xf32> to vector<8x128xf32>
    %23 = arith.mulf %21, %22 : vector<8x128xf32>
    %cst_8 = arith.constant dense<0.000000e+00> : vector<8x128xf32>
    %24 = tpu.matmul %23, %6, %cst_8 {dimension_numbers = #tpu.dot_dimension_numbers<[1], [0], [0], [1], [0, 0, 1, 1], [], []>, precision = #tpu.contract_precision<fp32>} : vector<8x128xf32>, vector<128x128xf32>, vector<8x128xf32> -> vector<8x128xf32>
    %25 = arith.addf %16, %24 : vector<8x128xf32>
    %c2_i32 = arith.constant 2 : i32
    %26 = vector.broadcast %c2_i32 : i32 to vector<1x128xi32>
    %27 = arith.cmpi eq, %7, %26 : vector<1x128xi32>
    %28 = arith.extui %27 : vector<1x128xi1> to vector<1x128xi32>
    %29 = arith.sitofp %28 : vector<1x128xi32> to vector<1x128xf32>
    %30 = math.tanh %25 : vector<8x128xf32>
    %31 = vector.broadcast %29 : vector<1x128xf32> to vector<8x128xf32>
    %32 = arith.mulf %30, %31 : vector<8x128xf32>
    %cst_9 = arith.constant dense<0.000000e+00> : vector<8x128xf32>
    %33 = tpu.matmul %32, %6, %cst_9 {dimension_numbers = #tpu.dot_dimension_numbers<[1], [0], [0], [1], [0, 0, 1, 1], [], []>, precision = #tpu.contract_precision<fp32>} : vector<8x128xf32>, vector<128x128xf32>, vector<8x128xf32> -> vector<8x128xf32>
    %34 = arith.addf %25, %33 : vector<8x128xf32>
    %c3_i32 = arith.constant 3 : i32
    %35 = vector.broadcast %c3_i32 : i32 to vector<1x128xi32>
    %36 = arith.cmpi eq, %7, %35 : vector<1x128xi32>
    %37 = arith.extui %36 : vector<1x128xi1> to vector<1x128xi32>
    %38 = arith.sitofp %37 : vector<1x128xi32> to vector<1x128xf32>
    %39 = math.tanh %34 : vector<8x128xf32>
    %40 = vector.broadcast %38 : vector<1x128xf32> to vector<8x128xf32>
    %41 = arith.mulf %39, %40 : vector<8x128xf32>
    %cst_10 = arith.constant dense<0.000000e+00> : vector<8x128xf32>
    %42 = tpu.matmul %41, %6, %cst_10 {dimension_numbers = #tpu.dot_dimension_numbers<[1], [0], [0], [1], [0, 0, 1, 1], [], []>, precision = #tpu.contract_precision<fp32>} : vector<8x128xf32>, vector<128x128xf32>, vector<8x128xf32> -> vector<8x128xf32>
    %43 = arith.addf %34, %42 : vector<8x128xf32>
    %44 = math.tanh %43 : vector<8x128xf32>
    %c0_11 = arith.constant 0 : index
    %c0_12 = arith.constant 0 : index
    %45 = vector.load %arg3[%c0_11, %c0_12] : memref<128x128xf32, #tpu.memory_space<vmem>>, vector<128x128xf32>
    %cst_13 = arith.constant dense<0.000000e+00> : vector<8x128xf32>
    %46 = tpu.matmul %44, %45, %cst_13 {dimension_numbers = #tpu.dot_dimension_numbers<[1], [0], [0], [1], [0, 0, 1, 1], [], []>, precision = #tpu.contract_precision<fp32>} : vector<8x128xf32>, vector<128x128xf32>, vector<8x128xf32> -> vector<8x128xf32>
    %47 = arith.addf %0, %46 : vector<8x128xf32>
    %c0_14 = arith.constant 0 : index
    %c0_15 = arith.constant 0 : index
    %48 = vector.load %arg7[%c0_14, %c0_15] : memref<8x128xf32, #tpu.memory_space<vmem>>, vector<8x128xf32>
    tpu.vector_store %arg7[%c0_14, %c0_15], %47 {strides = array<i32>} : memref<8x128xf32, #tpu.memory_space<vmem>>, vector<8x128xf32>,
    %49 = arith.mulf %44, %44 : vector<8x128xf32>
    %cst_16 = arith.constant 1.000000e+00 : f32
    %50 = vector.broadcast %cst_16 : f32 to vector<8x128xf32>
    %51 = arith.subf %50, %49 : vector<8x128xf32>
    %c0_17 = arith.constant 0 : index
    %c0_18 = arith.constant 0 : index
    %52 = vector.load %arg6[%c0_17, %c0_18] : memref<1x128xf32, #tpu.memory_space<vmem>>, vector<1x128xf32>
    %53 = vector.broadcast %52 : vector<1x128xf32> to vector<8x128xf32>
    %54 = arith.mulf %51, %53 : vector<8x128xf32>
    %cst_19 = arith.constant 1.000000e+00 : f32
    %55 = vector.broadcast %cst_19 : f32 to vector<8x128xf32>
    %56 = arith.addf %55, %54 : vector<8x128xf32>
    %57 = math.absf %56 : vector<8x128xf32>
    %58 = math.log %57 : vector<8x128xf32>
    %cst_20 = arith.constant 1.000000e+00 : f32
    %59 = vector.broadcast %cst_20 : f32 to vector<8x128xf32>
    "tpu.trace_start"() <{level = 10 : i32, message = "sk,tk->st"}> : () -> ()
    %cst_21 = arith.constant dense<0.000000e+00> : vector<8x8xf32>
    %60 = tpu.matmul %59, %58, %cst_21 {dimension_numbers = #tpu.dot_dimension_numbers<[1], [1], [0], [0], [0, 0, 1, 0], [], []>, precision = #tpu.contract_precision<fp32>} : vector<8x128xf32>, vector<8x128xf32>, vector<8x8xf32> -> vector<8x8xf32>
    "tpu.trace_stop"() : () -> ()
    %c0_22 = arith.constant 0 : index
    %c0_23 = arith.constant 0 : index
    %c0_24 = arith.constant 0 : index
    %61 = vector.load %arg8[%c0_22, %c0_23, %c0_24] : memref<1x8x8xf32, #tpu.memory_space<vmem>>, vector<1x8x8xf32>
    %62 = vector.shape_cast %61 : vector<1x8x8xf32> to vector<8x8xf32>
    %63 = vector.shape_cast %60 : vector<8x8xf32> to vector<1x8x8xf32>
    tpu.vector_store %arg8[%c0_22, %c0_23, %c0_24], %63 {strides = array<i32>} : memref<1x8x8xf32, #tpu.memory_space<vmem>>, vector<1x8x8xf32>,
    return
  }
  func.func @transform_0(%arg0: i32) -> (i32, i32) {
    %c0_i32 = arith.constant 0 : i32
    %c0_i32_0 = arith.constant 0 : i32
    return %arg0, %c0_i32 : i32, i32
  }
  func.func @transform_1(%arg0: i32) -> (i32, i32) {
    %c0_i32 = arith.constant 0 : i32
    %c0_i32_0 = arith.constant 0 : i32
    %c0_i32_1 = arith.constant 0 : i32
    return %c0_i32, %c0_i32_0 : i32, i32
  }
  func.func @transform_2(%arg0: i32) -> (i32, i32) {
    %c0_i32 = arith.constant 0 : i32
    %c0_i32_0 = arith.constant 0 : i32
    %c0_i32_1 = arith.constant 0 : i32
    return %c0_i32, %c0_i32_0 : i32, i32
  }
  func.func @transform_3(%arg0: i32) -> (i32, i32) {
    %c0_i32 = arith.constant 0 : i32
    %c0_i32_0 = arith.constant 0 : i32
    %c0_i32_1 = arith.constant 0 : i32
    return %c0_i32, %c0_i32_0 : i32, i32
  }
  func.func @transform_4(%arg0: i32) -> (i32, i32) {
    %c0_i32 = arith.constant 0 : i32
    %c0_i32_0 = arith.constant 0 : i32
    %c0_i32_1 = arith.constant 0 : i32
    return %c0_i32, %c0_i32_0 : i32, i32
  }
  func.func @transform_5(%arg0: i32) -> (i32, i32) {
    %c0_i32 = arith.constant 0 : i32
    %c0_i32_0 = arith.constant 0 : i32
    %c0_i32_1 = arith.constant 0 : i32
    return %c0_i32, %c0_i32_0 : i32, i32
  }
  func.func @transform_6(%arg0: i32) -> (i32, i32) {
    %c0_i32 = arith.constant 0 : i32
    %c0_i32_0 = arith.constant 0 : i32
    return %arg0, %c0_i32 : i32, i32
  }
  func.func @transform_7(%arg0: i32) -> (i32, i32, i32) {
    %c0_i32 = arith.constant 0 : i32
    %c0_i32_0 = arith.constant 0 : i32
    %c0_i32_1 = arith.constant 0 : i32
    return %arg0, %c0_i32, %c0_i32_0 : i32, i32, i32
  }
}

</mosaic_0001>

<bundles_post_ra>
// kernel: normalizing_flow_forward.1
= control target key start
LH: loop header
LB: loop body
LE: loop exit
PB: predicated region body
PF: predicated region fallthrough
CT: control target
= control target key end

     0   :  { %v7234_v0 = vmov 0.0|0.0   ;;  %vm7235_vm0 = vmmov 0   ;;  %v7236_v3 = vmov 0.0   ;;  %vm4403_vm5 = vcmask 64512   ;;  %s8791_s1 = inlined_call_operand.vmem [shape: f32[128,128], index: 1, kind: input, shape index: {}]   ;;  %s8792_s0 = inlined_call_operand.vmem [shape: f32[8,128], index: 0, kind: input, shape index: {}, may-alias: {0,6}]   ;;  %s8793_s3 = inlined_call_operand.vmem [shape: f32[128,128], index: 3, kind: input, shape index: {}]   ;;  %s8794_s4 = inlined_call_operand.vmem [shape: f32[1,128], index: 4, kind: input, shape index: {}]   ;;  %s8795_s2 = inlined_call_operand.vmem [shape: f32[128,128], index: 2, kind: input, shape index: {}]   ;;  %s8796_s5 = inlined_call_operand.vmem [shape: f32[1,128], index: 5, kind: input, shape index: {}]   ;;  %s8797_s6 = inlined_call_operand.vmem [shape: f32[8,128], index: 6, kind: output, shape index: {0}, may-alias: {0,6}]   ;;  %s8798_s7 = inlined_call_operand.vmem [shape: f32[1,8,8], index: 7, kind: output, shape index: {1}]  }
   0x1   :  { %6333 = vmatprep.subr.bf16.mxu0 %v7234_v0  ;;  %v26_v1 = vld [vmem:[%s8791_s1] sm:$0xff]  ;;  %v27_v2 = vld [vmem:[%s8791_s1 + $0x8] sm:$0xff]  ;;  %5075 = vmatprep.mubr.msk.f32.mxu0 %vm7235_vm0, %v7236_v3  ;;  %v28_v6 = vld [vmem:[%s8791_s1 + $0x10] sm:$0xff] }
   0x2   :  { %v50_v4 = vand.u32 4294901760, %v26_v1  ;;  %v53_v5 = vand.u32 4294901760, %v27_v2  ;;  %6477 = vmatprep.subr.bf16.mxu1 %v7234_v0  ;;  %5285 = vmatprep.mubr.msk.f32.mxu1 %vm7235_vm0, %v7236_v3  ;;  %v29_v7 = vld [vmem:[%s8791_s1 + $0x18] sm:$0xff]  ;;  %v56_v9 = vand.u32 4294901760, %v28_v6  ;;  %v30_v12 = vld [vmem:[%s8791_s1 + $0x20] sm:$0xff]  ;;  %v31_v13 = vld [vmem:[%s8791_s1 + $0x28] sm:$0xff] }
   0x3   :  { %v59_v10 = vand.u32 4294901760, %v29_v7  ;;  %v62_v14 = vand.u32 4294901760, %v30_v12  ;;  %v65_v15 = vand.u32 4294901760, %v31_v13  ;;  %v32_v17 = vld [vmem:[%s8791_s1 + $0x30] sm:$0xff]  ;;  %v33_v18 = vld [vmem:[%s8791_s1 + $0x38] sm:$0xff]  ;;  %v34_v26 = vld [vmem:[%s8791_s1 + $0x40] sm:$0xff] }
   0x4   :  { %v7296_v8 = vpack.c.bf16 %v53_v5, %v50_v4  ;;  %v68_v19 = vand.u32 4294901760, %v32_v17  ;;  %v71_v20 = vand.u32 4294901760, %v33_v18  ;;  %v7319_v21 = vsub.f32 %v26_v1, %v50_v4  ;;  %v35_v27 = vld [vmem:[%s8791_s1 + $0x48] sm:$0xff]  ;;  %v36_v41 = vld [vmem:[%s8791_s1 + $0x50] sm:$0xff]  ;;  %v37_v42 = vld [vmem:[%s8791_s1 + $0x58] sm:$0xff] }
   0x5   :  { %v7300_v11 = vpack.c.bf16 %v59_v10, %v56_v9  ;;  %v7310_v16 = vpack.c.bf16 %v65_v15, %v62_v14  ;;  %v7321_v22 = vsub.f32 %v27_v2, %v53_v5  ;;  %v7324_v23 = vsub.f32 %v28_v6, %v56_v9  ;;  %v38_v49 = vld [vmem:[%s8791_s1 + $0x60] sm:$0xff]  ;;  %v39_v50 = vld [vmem:[%s8791_s1 + $0x68] sm:$0xff]  ;;  %v40_v58 = vld [vmem:[%s8791_s1 + $0x70] sm:$0xff] }
   0x6   :  { %6335 = vmatpush3.bf16.xpose.msra.mxu0 %v7296_v8  ;;  %v7326_v24 = vsub.f32 %v29_v7, %v59_v10  ;;  %v7328_v25 = vsub.f32 %v30_v12, %v62_v14  ;;  %v7336_v28 = vsub.f32 %v31_v13, %v65_v15  ;;  %v7338_v29 = vsub.f32 %v32_v17, %v68_v19  ;;  %v25_v56 = vld [vmem:[%s8792_s0] sm:$0xff]  ;;  %v41_v59 = vld [vmem:[%s8791_s1 + $0x78] sm:$0xff] }
   0x7   :  { %6336 = vmatprep.subr.bf16.mxu0 %v7234_v0  ;;  %v7340_v30 = vsub.f32 %v33_v18, %v71_v20  ;;  %v6382_v31 = vpack.c.bf16 %v7321_v22, %v7319_v21  ;;  %v7344_v32 = vpack.c.bf16 %v71_v20, %v68_v19  ;;  %v74_v34 = vand.u32 4294901760, %v34_v26 }
   0x8   :  { %v6385_v33 = vpack.c.bf16 %v7326_v24, %v7324_v23  ;;  %v77_v35 = vand.u32 4294901760, %v35_v27  ;;  %v6388_v36 = vpack.c.bf16 %v7336_v28, %v7328_v25  ;;  %v80_v44 = vand.u32 4294901760, %v36_v41 }
   0x9   :  { %v6391_v37 = vpack.c.bf16 %v7340_v30, %v7338_v29  ;;  %v7352_v38 = vsub.f32 %v34_v26, %v74_v34  ;;  %v83_v45 = vand.u32 4294901760, %v37_v42  ;;  %v86_v52 = vand.u32 4294901760, %v38_v49 }
   0xa   :  { %v7354_v39 = vsub.f32 %v35_v27, %v77_v35  ;;  %v7366_v43 = vpack.c.bf16 %v77_v35, %v74_v34  ;;  %v7368_v46 = vsub.f32 %v36_v41, %v80_v44  ;;  %v89_v53 = vand.u32 4294901760, %v39_v50 }
   0xb   :  { %v7370_v47 = vsub.f32 %v37_v42, %v83_v45  ;;  %v7382_v51 = vpack.c.bf16 %v83_v45, %v80_v44  ;;  %v7384_v54 = vsub.f32 %v38_v49, %v86_v52  ;;  %v7401_v60 = vand.u32 4294901760, %v25_v56 }
   0xc   :  { %v6394_v40 = vpack.c.bf16 %v7354_v39, %v7352_v38  ;;  %v7386_v55 = vsub.f32 %v39_v50, %v89_v53  ;;  %v7403_v61 = vpack.c.bf16 %v89_v53, %v86_v52  ;;  %v92_v62 = vand.u32 4294901760, %v40_v58 }
   0xd   :  { %v6397_v48 = vpack.c.bf16 %v7370_v47, %v7368_v46  ;;  %v95_v63 = vand.u32 4294901760, %v41_v59  ;;  %v7410_v4 = vsub.f32 %v25_v56, %v7401_v60  ;;  %v143_v5 = vand.u32 4294901760, %v7319_v21 }
   0xe   :  { %6338 = vmatpush3.bf16.xpose.msra.mxu0 %v7300_v11  ;;  %v6400_v57 = vpack.c.bf16 %v7386_v55, %v7384_v54  ;;  %v7405_v1 = vsub.f32 %v40_v58, %v92_v62  ;;  %v150_v6 = vand.u32 4294901760, %v7321_v22  ;;  %v157_v18 = vand.u32 4294901760, %v7324_v23 }
   0xf   :  { %6339 = vmatprep.subr.bf16.mxu0 %v7234_v0  ;;  %v7407_v2 = vsub.f32 %v41_v59, %v95_v63  ;;  %v132_v9 = vand.u32 4294901760, %v7410_v4  ;;  %v7419_v10 = vpack.c.bf16 %v95_v63, %v92_v62  ;;  %v144_v12 = vsub.f32 %v7319_v21, %v143_v5  ;;  %v7573_v21 = vld [vmem:[%s8793_s3 + $0x10] sm:$0xff] }
  0x10   :  { %v151_v13 = vsub.f32 %v7321_v22, %v150_v6  ;;  %v164_v19 = vand.u32 4294901760, %v7326_v24  ;;  %v158_v27 = vsub.f32 %v7324_v23, %v157_v18  ;;  %v171_v42 = vand.u32 4294901760, %v7328_v25 }
  0x11   :  { %v6403_v7 = vpack.c.bf16 %v7407_v2, %v7405_v1  ;;  %v133_v14 = vsub.f32 %v7410_v4, %v132_v9  ;;  %v145_v15 = vand.u32 4294901760, %v144_v12  ;;  %v178_v44 = vand.u32 4294901760, %v7336_v28 }
  0x12   :  { %v152_v17 = vand.u32 4294901760, %v151_v13  ;;  %v165_v34 = vsub.f32 %v7326_v24, %v164_v19  ;;  %v159_v35 = vand.u32 4294901760, %v158_v27  ;;  %v172_v49 = vsub.f32 %v7328_v25, %v171_v42 }
  0x13   :  { %v134_v20 = vand.u32 4294901760, %v133_v14  ;;  %v179_v50 = vsub.f32 %v7336_v28, %v178_v44  ;;  %v185_v56 = vand.u32 4294901760, %v7338_v29  ;;  %v192_v58 = vand.u32 4294901760, %v7340_v30 }
  0x14   :  { %v6358_v26 = vpack.c.bf16 %v152_v17, %v145_v15  ;;  %v166_v41 = vand.u32 4294901760, %v165_v34  ;;  %v173_v52 = vand.u32 4294901760, %v172_v49  ;;  %v199_v14 = vand.u32 4294901760, %v7352_v38 }
  0x15   :  { %v180_v53 = vand.u32 4294901760, %v179_v50  ;;  %v186_v62 = vsub.f32 %v7338_v29, %v185_v56  ;;  %v193_v63 = vsub.f32 %v7340_v30, %v192_v58  ;;  %v206_v15 = vand.u32 4294901760, %v7354_v39 }
  0x16   :  { %6341 = vmatpush3.bf16.xpose.msra.mxu0 %v7310_v16  ;;  %v6361_v45 = vpack.c.bf16 %v166_v41, %v159_v35  ;;  %v213_v35 = vand.u32 4294901760, %v7368_v46  ;;  %v220_v41 = vand.u32 4294901760, %v7370_v47  ;;  %v6436_v23 = vpack.c.bf16 %v178_v44, %v171_v42 }
  0x17   :  { %6342 = vmatprep.subr.bf16.mxu0 %v7234_v0  ;;  %v6364_v59 = vpack.c.bf16 %v180_v53, %v173_v52  ;;  %v187_v12 = vand.u32 4294901760, %v186_v62  ;;  %v194_v13 = vand.u32 4294901760, %v193_v63  ;;  %v234_v62 = vand.u32 4294901760, %v7386_v55 }
  0x18   :  { %v214_v49 = vsub.f32 %v7368_v46, %v213_v35  ;;  %v221_v50 = vsub.f32 %v7370_v47, %v220_v41  ;;  %v6439_v24 = vpack.c.bf16 %v192_v58, %v185_v56  ;;  %v6445_v25 = vpack.c.bf16 %v220_v41, %v213_v35  ;;  %v698_v47 = vld [vmem:[%s8793_s3 + $0x40] sm:$0xff]  ;;  %v704_v58 = vld [vmem:[%s8793_s3 + $0x70] sm:$0xff] }
  0x19   :  { %v6367_v17 = vpack.c.bf16 %v194_v13, %v187_v12  ;;  %v235_v13 = vsub.f32 %v7386_v55, %v234_v62  ;;  %v756_v35 = vand.u32 4294901760, %v704_v58 }
  0x1a   :  { %v215_v52 = vand.u32 4294901760, %v214_v49  ;;  %v222_v53 = vand.u32 4294901760, %v221_v50 }
  0x1c   :  { %v6373_v63 = vpack.c.bf16 %v222_v53, %v215_v52 }
  0x1e   :  { %6344 = vmatpush3.bf16.xpose.msra.mxu0 %v7344_v32 }
  0x1f   :  { %6345 = vmatprep.subr.bf16.mxu0 %v7234_v0 }
  0x26   :  { %6347 = vmatpush3.bf16.xpose.msra.mxu0 %v7366_v43 }
  0x27   :  { %6348 = vmatprep.subr.bf16.mxu0 %v7234_v0 }
  0x2e   :  { %6350 = vmatpush3.bf16.xpose.msra.mxu0 %v7382_v51 }
  0x2f   :  { %6351 = vmatprep.subr.bf16.mxu0 %v7234_v0 }
  0x36   :  { %6353 = vmatpush3.bf16.xpose.msra.mxu0 %v7403_v61 }
  0x37   :  { %6354 = vmatprep.subr.bf16.mxu0 %v7234_v0 }
  0x3e   :  { %6356 = vmatpush3.bf16.xpose.msra.mxu0 %v7419_v10 }
  0x3f   :  { %6357 = vmatprep.subr.bf16.mxu0 %v7234_v0 }
  0x45   :  { %5076 = vmatmul.mubr.f32.vlgmr.msra.gmra.mrb[0].mxu0 %v134_v20  ;;  %v200_v20 = vsub.f32 %v7352_v38, %v199_v14  ;;  %v696_v38 = vld [vmem:[%s8793_s3 + $0x30] sm:$0xff] }
  0x46   :  { %6359 = vmatpush3.bf16.xpose.msra.mxu0 %v6358_v26  ;;  %5110 = vmatprep.mubr.msk.f32.mxu0 %vm7235_vm0, %v7236_v3  ;;  %v207_v26 = vsub.f32 %v7354_v39, %v206_v15  ;;  %v697_v39 = vld [vmem:[%s8793_s3 + $0x38] sm:$0xff] }
  0x47   :  { %6360 = vmatprep.subr.bf16.mxu0 %v7234_v0  ;;  %v201_v27 = vand.u32 4294901760, %v200_v20  ;;  %v236_v20 = vand.u32 4294901760, %v235_v13  ;;  %v735_v46 = vand.u32 4294901760, %v697_v39 }
  0x48   :  { %v208_v34 = vand.u32 4294901760, %v207_v26  ;;  %v241_v26 = vand.u32 4294901760, %v7405_v1 }
  0x4e   :  { %6362 = vmatpush3.bf16.xpose.msra.mxu0 %v6361_v45  ;;  %v6370_v45 = vpack.c.bf16 %v208_v34, %v201_v27  ;;  %v248_v27 = vand.u32 4294901760, %v7407_v2 }
  0x4f   :  { %6363 = vmatprep.subr.bf16.mxu0 %v7234_v0 }
  0x50   :  { %v249_v49 = vsub.f32 %v7407_v2, %v248_v27  ;;  %v6451_v29 = vpack.c.bf16 %v248_v27, %v241_v26  ;;  %v7751_v27 = vsub.f32 %v697_v39, %v735_v46 }
  0x52   :  { %v250_v52 = vand.u32 4294901760, %v249_v49 }
  0x56   :  { %6365 = vmatpush3.bf16.xpose.msra.mxu0 %v6364_v59  ;;  %v227_v59 = vand.u32 4294901760, %v7384_v54 }
  0x57   :  { %6366 = vmatprep.subr.bf16.mxu0 %v7234_v0 }
  0x58   :  { %v228_v12 = vsub.f32 %v7384_v54, %v227_v59  ;;  %v6448_v28 = vpack.c.bf16 %v234_v62, %v227_v59  ;;  %v7688_v54 = vld [vmem:[%s8793_s3 + $0x50] sm:$0xff] }
  0x5e   :  { %6368 = vmatpush3.bf16.xpose.msra.mxu0 %v6367_v17  ;;  %v229_v17 = vand.u32 4294901760, %v228_v12 }
  0x5f   :  { %6369 = vmatprep.subr.bf16.mxu0 %v7234_v0 }
  0x60   :  { %v6376_v34 = vpack.c.bf16 %v236_v20, %v229_v17 }
  0x66   :  { %6371 = vmatpush3.bf16.xpose.msra.mxu0 %v6370_v45  ;;  %v242_v45 = vsub.f32 %v7405_v1, %v241_v26  ;;  %v701_v1 = vld [vmem:[%s8793_s3 + $0x58] sm:$0xff] }
  0x67   :  { %6372 = vmatprep.subr.bf16.mxu0 %v7234_v0 }
  0x68   :  { %v243_v50 = vand.u32 4294901760, %v242_v45 }
  0x6a   :  { %v6379_v53 = vpack.c.bf16 %v250_v52, %v243_v50  ;;  %v856_v50 = vand.u32 4294901760, %v7751_v27 }
  0x6e   :  { %6374 = vmatpush3.bf16.xpose.msra.mxu0 %v6373_v63 }
  0x6f   :  { %6375 = vmatprep.subr.bf16.mxu0 %v7234_v0 }
  0x76   :  { %6377 = vmatpush3.bf16.xpose.msra.mxu0 %v6376_v34 }
  0x77   :  { %6378 = vmatprep.subr.bf16.mxu0 %v7234_v0 }
  0x7e   :  { %6380 = vmatpush3.bf16.xpose.msra.mxu0 %v6379_v53 }
  0x7f   :  { %6381 = vmatprep.subr.bf16.mxu0 %v7234_v0 }
  0x85   :  { %5111 = vmatmul.mubr.f32.vlgmr.msra.gmra.mrb[0].mxu0 %v7401_v60 }
  0x86   :  { %6383 = vmatpush3.bf16.xpose.msra.mxu0 %v6382_v31  ;;  %5145 = vmatprep.mubr.msk.f32.mxu0 %vm7235_vm0, %v7236_v3  ;;  %v6430_v31 = vpack.c.bf16 %v150_v6, %v143_v5  ;;  %v6433_v5 = vpack.c.bf16 %v164_v19, %v157_v18  ;;  %v702_v18 = vld [vmem:[%s8793_s3 + $0x60] sm:$0xff]  ;;  %v703_v19 = vld [vmem:[%s8793_s3 + $0x68] sm:$0xff] }
  0x87   :  { %6384 = vmatprep.subr.bf16.mxu0 %v7234_v0  ;;  %v750_v44 = vand.u32 4294901760, %v702_v18  ;;  %v753_v56 = vand.u32 4294901760, %v703_v19 }
  0x8e   :  { %6386 = vmatpush3.bf16.xpose.msra.mxu0 %v6385_v33  ;;  %v7563_v33 = vld [vmem:[%s8793_s3] sm:$0xff] }
  0x8f   :  { %6387 = vmatprep.subr.bf16.mxu0 %v7234_v0  ;;  %v714_v22 = vand.u32 4294901760, %v7563_v33 }
  0x96   :  { %6389 = vmatpush3.bf16.xpose.msra.mxu0 %v6388_v36  ;;  %v7568_v36 = vld [vmem:[%s8793_s3 + $0x8] sm:$0xff] }
  0x97   :  { %6390 = vmatprep.subr.bf16.mxu0 %v7234_v0 }
  0x9e   :  { %6392 = vmatpush3.bf16.xpose.msra.mxu0 %v6391_v37  ;;  %v717_v37 = vand.u32 4294901760, %v7568_v36 }
  0x9f   :  { %6393 = vmatprep.subr.bf16.mxu0 %v7234_v0 }
  0xa6   :  { %6395 = vmatpush3.bf16.xpose.msra.mxu0 %v6394_v40  ;;  %v7581_v40 = vld [vmem:[%s8793_s3 + $0x18] sm:$0xff] }
  0xa7   :  { %6396 = vmatprep.subr.bf16.mxu0 %v7234_v0 }
  0xae   :  { %6398 = vmatpush3.bf16.xpose.msra.mxu0 %v6397_v48  ;;  %v720_v48 = vand.u32 4294901760, %v7573_v21 }
  0xaf   :  { %6399 = vmatprep.subr.bf16.mxu0 %v7234_v0 }
  0xb6   :  { %6401 = vmatpush3.bf16.xpose.msra.mxu0 %v6400_v57  ;;  %v723_v57 = vand.u32 4294901760, %v7581_v40 }
  0xb7   :  { %6402 = vmatprep.subr.bf16.mxu0 %v7234_v0 }
  0xb8   :  { %v7600_v6 = vpack.c.bf16 %v723_v57, %v720_v48 }
  0xbe   :  { %6404 = vmatpush3.bf16.xpose.msra.mxu0 %v6403_v7  ;;  %v6442_v7 = vpack.c.bf16 %v206_v15, %v199_v14  ;;  %v705_v14 = vld [vmem:[%s8793_s3 + $0x78] sm:$0xff]  ;;  %v7722_v15 = vpack.c.bf16 %v753_v56, %v750_v44 }
  0xbf   :  { %6405 = vmatprep.subr.bf16.mxu0 %v7234_v0  ;;  %v759_v41 = vand.u32 4294901760, %v705_v14 }
  0xc1   :  { %v7728_v59 = vpack.c.bf16 %v759_v41, %v756_v35 }
  0xc5   :  { %5146 = vmatmul.mubr.f32.vlgmr.msra.gmra.mrb[0].mxu0 %v7410_v4  ;;  %v7589_v4 = vpack.c.bf16 %v717_v37, %v714_v22 }
  0xc6   :  { %6407 = vmatpush3.bf16.xpose.msra.mxu0 %v7296_v8  ;;  %5180 = vmatprep.mubr.msk.f32.mxu0 %vm7235_vm0, %v7236_v3 }
  0xc7   :  { %6408 = vmatprep.subr.bf16.mxu0 %v7234_v0  ;;  %6479 = vmatpush3.bf16.msra.mxu1 %v7589_v4 }
  0xc8   :  { %6480 = vmatprep.subr.bf16.mxu1 %v7234_v0 }
  0xcb   :  { %6482 = vmatpush3.bf16.msra.mxu1 %v7600_v6 }
  0xcc   :  { %6483 = vmatprep.subr.bf16.mxu1 %v7234_v0 }
  0xce   :  { %6410 = vmatpush3.bf16.xpose.msra.mxu0 %v7300_v11 }
  0xcf   :  { %6411 = vmatprep.subr.bf16.mxu0 %v7234_v0 }
  0xd6   :  { %6413 = vmatpush3.bf16.xpose.msra.mxu0 %v7310_v16 }
  0xd7   :  { %6414 = vmatprep.subr.bf16.mxu0 %v7234_v0 }
  0xde   :  { %6416 = vmatpush3.bf16.xpose.msra.mxu0 %v7344_v32 }
  0xdf   :  { %6417 = vmatprep.subr.bf16.mxu0 %v7234_v0 }
  0xe6   :  { %6419 = vmatpush3.bf16.xpose.msra.mxu0 %v7366_v43 }
  0xe7   :  { %6420 = vmatprep.subr.bf16.mxu0 %v7234_v0 }
  0xee   :  { %6422 = vmatpush3.bf16.xpose.msra.mxu0 %v7382_v51 }
  0xef   :  { %6423 = vmatprep.subr.bf16.mxu0 %v7234_v0 }
  0xf6   :  { %6425 = vmatpush3.bf16.xpose.msra.mxu0 %v7403_v61 }
  0xf7   :  { %6426 = vmatprep.subr.bf16.mxu0 %v7234_v0 }
  0xfe   :  { %6428 = vmatpush3.bf16.xpose.msra.mxu0 %v7419_v10 }
  0xff   :  { %6429 = vmatprep.subr.bf16.mxu0 %v7234_v0 }
 0x105   :  { %5181 = vmatmul.mubr.f32.vlgmr.msra.gmra.mrb[0].mxu0 %v132_v9  ;;  %v744_v9 = vand.u32 4294901760, %v7688_v54 }
 0x106   :  { %6431 = vmatpush3.bf16.xpose.msra.mxu0 %v6430_v31  ;;  %5215 = vmatprep.mubr.msk.f32.mxu0 %vm7235_vm0, %v7236_v3 }
 0x107   :  { %6432 = vmatprep.subr.bf16.mxu0 %v7234_v0 }
 0x10e   :  { %6434 = vmatpush3.bf16.xpose.msra.mxu0 %v6433_v5 }
 0x10f   :  { %6435 = vmatprep.subr.bf16.mxu0 %v7234_v0 }
 0x116   :  { %6437 = vmatpush3.bf16.xpose.msra.mxu0 %v6436_v23  ;;  %v857_v23 = vsub.f32 %v7751_v27, %v856_v50 }
 0x117   :  { %6438 = vmatprep.subr.bf16.mxu0 %v7234_v0 }
 0x11e   :  { %6440 = vmatpush3.bf16.xpose.msra.mxu0 %v6439_v24 }
 0x11f   :  { %6441 = vmatprep.subr.bf16.mxu0 %v7234_v0 }
 0x126   :  { %6443 = vmatpush3.bf16.xpose.msra.mxu0 %v6442_v7 }
 0x127   :  { %6444 = vmatprep.subr.bf16.mxu0 %v7234_v0 }
 0x12e   :  { %6446 = vmatpush3.bf16.xpose.msra.mxu0 %v6445_v25 }
 0x12f   :  { %6447 = vmatprep.subr.bf16.mxu0 %v7234_v0 }
 0x136   :  { %6449 = vmatpush3.bf16.xpose.msra.mxu0 %v6448_v28  ;;  %v858_v28 = vand.u32 4294901760, %v857_v23 }
 0x137   :  { %6450 = vmatprep.subr.bf16.mxu0 %v7234_v0 }
 0x13e   :  { %6452 = vmatpush3.bf16.xpose.msra.mxu0 %v6451_v29 }
 0x13f   :  { %6453 = vmatprep.subr.bf16.mxu0 %v7234_v0 }
 0x145   :  { %5216 = vmatmul.mubr.f32.vlgmr.msra.gmra.mrb[0].mxu0 %v7401_v60 }
 0x146   :  { %6455 = vmatpush3.bf16.xpose.msra.mxu0 %v7296_v8  ;;  %5250 = vmatprep.mubr.msk.f32.mxu0 %vm7235_vm0, %v7236_v3  ;;  %v694_v8 = vld [vmem:[%s8793_s3 + $0x20] sm:$0xff] }
 0x147   :  { %6456 = vmatprep.subr.bf16.mxu0 %v7234_v0 }
 0x14e   :  { %6458 = vmatpush3.bf16.xpose.msra.mxu0 %v7300_v11  ;;  %v695_v11 = vld [vmem:[%s8793_s3 + $0x28] sm:$0xff] }
 0x14f   :  { %6459 = vmatprep.subr.bf16.mxu0 %v7234_v0  ;;  %v729_v30 = vand.u32 4294901760, %v695_v11 }
 0x151   :  { %v7739_v63 = vsub.f32 %v695_v11, %v729_v30  ;;  %v7776_v11 = vsub.f32 %v7688_v54, %v744_v9 }
 0x153   :  { %v842_v13 = vand.u32 4294901760, %v7739_v63 }
 0x155   :  { %v843_v20 = vsub.f32 %v7739_v63, %v842_v13 }
 0x156   :  { %6461 = vmatpush3.bf16.xpose.msra.mxu0 %v7310_v16  ;;  %v726_v16 = vand.u32 4294901760, %v694_v8 }
 0x157   :  { %6462 = vmatprep.subr.bf16.mxu0 %v7234_v0  ;;  %v844_v45 = vand.u32 4294901760, %v843_v20 }
 0x158   :  { %v7737_v62 = vsub.f32 %v694_v8, %v726_v16 }
 0x15a   :  { %v835_v12 = vand.u32 4294901760, %v7737_v62 }
 0x15c   :  { %v836_v17 = vsub.f32 %v7737_v62, %v835_v12 }
 0x15e   :  { %6464 = vmatpush3.bf16.xpose.msra.mxu0 %v7344_v32  ;;  %v7668_v32 = vpack.c.bf16 %v729_v30, %v726_v16  ;;  %v837_v34 = vand.u32 4294901760, %v836_v17 }
 0x15f   :  { %6465 = vmatprep.subr.bf16.mxu0 %v7234_v0 }
 0x160   :  { %6485 = vmatpush3.bf16.msra.mxu1 %v7668_v32  ;;  %v7755_v52 = vpack.c.bf16 %v844_v45, %v837_v34  ;;  %v7803_v45 = vsub.f32 %v704_v58, %v756_v35 }
 0x161   :  { %6486 = vmatprep.subr.bf16.mxu1 %v7234_v0 }
 0x166   :  { %6467 = vmatpush3.bf16.xpose.msra.mxu0 %v7366_v43  ;;  %v732_v43 = vand.u32 4294901760, %v696_v38 }
 0x167   :  { %6468 = vmatprep.subr.bf16.mxu0 %v7234_v0 }
 0x168   :  { %v7691_v55 = vpack.c.bf16 %v735_v46, %v732_v43  ;;  %v7749_v26 = vsub.f32 %v696_v38, %v732_v43  ;;  %v877_v43 = vand.u32 4294901760, %v7776_v11 }
 0x16a   :  { %6488 = vmatpush3.bf16.msra.mxu1 %v7691_v55  ;;  %v849_v49 = vand.u32 4294901760, %v7749_v26 }
 0x16b   :  { %6489 = vmatprep.subr.bf16.mxu1 %v7234_v0 }
 0x16c   :  { %v850_v53 = vsub.f32 %v7749_v26, %v849_v49 }
 0x16e   :  { %6470 = vmatpush3.bf16.xpose.msra.mxu0 %v7382_v51  ;;  %v699_v51 = vld [vmem:[%s8793_s3 + $0x48] sm:$0xff]  ;;  %v851_v24 = vand.u32 4294901760, %v850_v53  ;;  %v7805_v53 = vsub.f32 %v705_v14, %v759_v41 }
 0x16f   :  { %6471 = vmatprep.subr.bf16.mxu0 %v7234_v0 }
 0x170   :  { %v7780_v30 = vpack.c.bf16 %v858_v28, %v851_v24 }
 0x176   :  { %6473 = vmatpush3.bf16.xpose.msra.mxu0 %v7403_v61  ;;  %v741_v61 = vand.u32 4294901760, %v699_v51 }
 0x177   :  { %6474 = vmatprep.subr.bf16.mxu0 %v7234_v0 }
 0x178   :  { %v7762_v5 = vsub.f32 %v699_v51, %v741_v61  ;;  %v878_v51 = vsub.f32 %v7776_v11, %v877_v43 }
 0x17a   :  { %v870_v25 = vand.u32 4294901760, %v7762_v5 }
 0x17c   :  { %v871_v8 = vsub.f32 %v7762_v5, %v870_v25 }
 0x17e   :  { %6476 = vmatpush3.bf16.xpose.msra.mxu0 %v7419_v10  ;;  %v747_v10 = vand.u32 4294901760, %v701_v1  ;;  %v872_v39 = vand.u32 4294901760, %v871_v8  ;;  %v7828_v8 = vpack.c.bf16 %v7751_v27, %v7749_v26 }
 0x17f   :  { %6765 = vmatprep.subr.bf16.mxu0 %v7234_v0 }
 0x180   :  { %v7710_v42 = vpack.c.bf16 %v747_v10, %v744_v9  ;;  %v7778_v16 = vsub.f32 %v701_v1, %v747_v10  ;;  %v879_v1 = vand.u32 4294901760, %v878_v51 }
 0x182   :  { %v8803_v46 = vand.u32 4294901760, %v7778_v16 }
 0x184   :  { %v885_v54 = vsub.f32 %v7778_v16, %v8803_v46 }
 0x185   :  { %5251 = vmatmul.mubr.f32.vlgmr.msra.gmra.mrb[0].mxu0 %v7401_v60  ;;  %v738_v60 = vand.u32 4294901760, %v698_v47 }
 0x186   :  { %6767 = vmatpush3.bf16.msra.mxu0 %v7589_v4  ;;  %5705 = vmatprep.mubr.msk.f32.mxu0 %vm7235_vm0, %v7236_v3  ;;  %v886_v9 = vand.u32 4294901760, %v885_v54  ;;  %v7844_v54 = vpack.c.bf16 %v7805_v53, %v7803_v45 }
 0x187   :  { %6768 = vmatprep.subr.bf16.mxu0 %v7234_v0  ;;  %v7697_v2 = vpack.c.bf16 %v741_v61, %v738_v60  ;;  %v7760_v31 = vsub.f32 %v698_v47, %v738_v60  ;;  %v7792_v60 = vsub.f32 %v702_v18, %v750_v44  ;;  %v7794_v61 = vsub.f32 %v703_v19, %v753_v56 }
 0x188   :  { %v7798_v20 = vpack.c.bf16 %v886_v9, %v879_v1  ;;  %v8800_v44 = vand.u32 4294901760, %v7803_v45  ;;  %v8799_v56 = vand.u32 4294901760, %v7805_v53  ;;  %v4413_v1 = vld [vmem:[%s8794_s4] ss:$0 sm:$0xff]  ;;  %v706_v9 = vlaneseq }
 0x189   :  { %6491 = vmatpush3.bf16.msra.mxu1 %v7697_v2  ;;  %v863_v7 = vand.u32 4294901760, %v7760_v31  ;;  %v8802_v10 = vand.u32 4294901760, %v7792_v60  ;;  %v8801_v17 = vand.u32 4294901760, %v7794_v61  ;;  %v7840_v51 = vpack.c.bf16 %v7794_v61, %v7792_v60 }
 0x18a   :  { %6770 = vmatpush3.bf16.msra.mxu0 %v7600_v6  ;;  %6492 = vmatprep.subr.bf16.mxu1 %v7234_v0  ;;  %v906_v24 = vsub.f32 %v7803_v45, %v8800_v44  ;;  %v913_v58 = vsub.f32 %v7805_v53, %v8799_v56  ;;  %v8812_v26 = vand.u32 4294901760, %v7794_v61 }
 0x18b   :  { %6771 = vmatprep.subr.bf16.mxu0 %v7234_v0  ;;  %v864_v29 = vsub.f32 %v7760_v31, %v863_v7  ;;  %v892_v34 = vsub.f32 %v7792_v60, %v8802_v10  ;;  %v899_v18 = vsub.f32 %v7794_v61, %v8801_v17 }
 0x18c   :  { %v907_v35 = vand.u32 4294901760, %v906_v24  ;;  %v914_v41 = vand.u32 4294901760, %v913_v58  ;;  %v7858_v24 = vsub.f32 %v7563_v33, %v714_v22  ;;  %v7863_v58 = vsub.f32 %v7568_v36, %v717_v37 }
 0x18d   :  { %6494 = vmatpush3.bf16.msra.mxu1 %v7710_v42  ;;  %v865_v38 = vand.u32 4294901760, %v864_v29  ;;  %v893_v19 = vand.u32 4294901760, %v892_v34  ;;  %v900_v23 = vand.u32 4294901760, %v899_v18  ;;  %v7824_v29 = vpack.c.bf16 %v7739_v63, %v7737_v62 }
 0x18e   :  { %6773 = vmatpush3.bf16.msra.mxu0 %v7668_v32  ;;  %6495 = vmatprep.subr.bf16.mxu1 %v7234_v0  ;;  %v7820_v28 = vpack.c.bf16 %v914_v41, %v907_v35  ;;  %v807_v41 = vand.u32 4294901760, %v7858_v24  ;;  %v7876_v33 = vsub.f32 %v7581_v40, %v723_v57  ;;  %v8008_v62 = vpack.c.bf16 %v870_v25, %v863_v7 }
 0x18f   :  { %6774 = vmatprep.subr.bf16.mxu0 %v7234_v0  ;;  %v7784_v47 = vpack.c.bf16 %v872_v39, %v865_v38  ;;  %v7818_v14 = vpack.c.bf16 %v900_v23, %v893_v19  ;;  %v7832_v38 = vpack.c.bf16 %v7762_v5, %v7760_v31  ;;  %v7836_v39 = vpack.c.bf16 %v7778_v16, %v7776_v11 }
 0x190   :  { %v7852_v23 = vand.u32 127, %v706_v9  ;;  %v7871_v9 = vsub.f32 %v7573_v21, %v720_v48  ;;  %v808_v36 = vsub.f32 %v7858_v24, %v807_v41  ;;  %v828_v21 = vand.u32 4294901760, %v7876_v33 }
 0x191   :  { %6497 = vmatpush3.bf16.msra.mxu1 %v7722_v15  ;;  %v8810_v63 = vand.u32 4294901760, %v7778_v16 }
 0x192   :  { %6776 = vmatpush3.bf16.msra.mxu0 %v7691_v55  ;;  %6498 = vmatprep.subr.bf16.mxu1 %v7234_v0  ;;  %vm708_vm1 = vcmp.eq.s32.totalorder %v7852_v23, 0  ;;  %v809_v40 = vand.u32 4294901760, %v808_v36  ;;  %vm1355_vm2 = vcmp.eq.s32.totalorder %v7852_v23, 1  ;;  %vm2002_vm3 = vcmp.eq.s32.totalorder %v7852_v23, 2 }
 0x193   :  { %6777 = vmatprep.subr.bf16.mxu0 %v7234_v0  ;;  %v4414_v35 = vsel %vm708_vm1, 1.0, %v7236_v3  ;;  %vm2649_vm4 = vcmp.eq.s32.totalorder %v7852_v23, 3 }
 0x195   :  { %6500 = vmatpush3.bf16.msra.mxu1 %v7728_v59 }
 0x196   :  { %6779 = vmatpush3.bf16.msra.mxu0 %v7697_v2  ;;  %6501 = vmatprep.subr.bf16.mxu1 %v7234_v0 }
 0x197   :  { %6780 = vmatprep.subr.bf16.mxu0 %v7234_v0 }
 0x19a   :  { %6782 = vmatpush3.bf16.msra.mxu0 %v7710_v42 }
 0x19b   :  { %6783 = vmatprep.subr.bf16.mxu0 %v7234_v0 }
 0x19e   :  { %6785 = vmatpush3.bf16.msra.mxu0 %v7722_v15 }
 0x19f   :  { %6786 = vmatprep.subr.bf16.mxu0 %v7234_v0 }
 0x1a2   :  { %6788 = vmatpush3.bf16.msra.mxu0 %v7728_v59 }
 0x1a3   :  { %6813 = vmatprep.subr.bf16.mxu0 %v7234_v0 }
 0x258   :  { %v686_v34 = vpop.f32.mrb[0].mxu0 }
 0x259   :  { %v7849_v18 = vadd.f32 %v4413_v1, %v686_v34  ;;  %v5252_v19 = vpop.f32.mrb[1].mxu0  ;;  %v814_v1 = vand.u32 4294901760, %v7863_v58 }
 0x25a   :  { %v821_v19 = vand.u32 4294901760, %v7871_v9 }
 0x25b   :  { %7221 = vtanh.f32 %v7849_v18  ;;  %v815_v37 = vsub.f32 %v7863_v58, %v814_v1 }
 0x25d   :  { %v816_v57 = vand.u32 4294901760, %v815_v37 }
 0x25f   :  { %v7901_v10 = vpack.c.bf16 %v816_v57, %v809_v40  ;;  %v7972_v40 = vpack.c.bf16 %v814_v1, %v807_v41  ;;  %v7982_v57 = vpack.c.bf16 %v828_v21, %v821_v19 }
 0x265   :  { %v7222_v22 = vpop.eup %7221 }
 0x266   :  { %v712_v34 = vmul.f32 %v7222_v22, %v4414_v35  ;;  %v822_v35 = vsub.f32 %v7871_v9, %v821_v19  ;;  %v829_v22 = vsub.f32 %v7876_v33, %v828_v21 }
 0x268   :  { %v7886_v48 = vand.u32 4294901760, %v712_v34  ;;  %v830_v46 = vand.u32 4294901760, %v829_v22 }
 0x26a   :  { %v7889_v56 = vsub.f32 %v712_v34, %v7886_v48  ;;  %v823_v34 = vand.u32 4294901760, %v822_v35 }
 0x26c   :  { %v796_v44 = vand.u32 4294901760, %v7889_v56  ;;  %v7904_v37 = vpack.c.bf16 %v830_v46, %v823_v34  ;;  %v7924_v46 = vpack.c.bf16 %v7863_v58, %v7858_v24 }
 0x26e   :  { %v797_v17 = vsub.f32 %v7889_v56, %v796_v44 }
 0x270   :  { %v798_v36 = vand.u32 4294901760, %v797_v17  ;;  %v7931_v17 = vpack.c.bf16 %v7876_v33, %v7871_v9 }
 0x272   :  { %5286 = vmatmul.mubr.f32.vlgmr.msra.gmra.mrb[0].mxu1 %v798_v36 }
 0x273   :  { %6503 = vmatpush3.bf16.msra.mxu1 %v7901_v10  ;;  %5320 = vmatprep.mubr.msk.f32.mxu1 %vm7235_vm0, %v7236_v3 }
 0x274   :  { %6504 = vmatprep.subr.bf16.mxu1 %v7234_v0 }
 0x277   :  { %6506 = vmatpush3.bf16.msra.mxu1 %v7904_v37 }
 0x278   :  { %6507 = vmatprep.subr.bf16.mxu1 %v7234_v0 }
 0x27b   :  { %6509 = vmatpush3.bf16.msra.mxu1 %v7755_v52 }
 0x27c   :  { %6510 = vmatprep.subr.bf16.mxu1 %v7234_v0 }
 0x27f   :  { %6512 = vmatpush3.bf16.msra.mxu1 %v7780_v30 }
 0x280   :  { %6513 = vmatprep.subr.bf16.mxu1 %v7234_v0 }
 0x283   :  { %6515 = vmatpush3.bf16.msra.mxu1 %v7784_v47 }
 0x284   :  { %6516 = vmatprep.subr.bf16.mxu1 %v7234_v0 }
 0x287   :  { %6518 = vmatpush3.bf16.msra.mxu1 %v7798_v20 }
 0x288   :  { %6519 = vmatprep.subr.bf16.mxu1 %v7234_v0 }
 0x28b   :  { %6521 = vmatpush3.bf16.msra.mxu1 %v7818_v14 }
 0x28c   :  { %6522 = vmatprep.subr.bf16.mxu1 %v7234_v0 }
 0x28f   :  { %6524 = vmatpush3.bf16.msra.mxu1 %v7820_v28 }
 0x290   :  { %6525 = vmatprep.subr.bf16.mxu1 %v7234_v0 }
 0x292   :  { %5321 = vmatmul.mubr.f32.vlgmr.msra.gmra.mrb[2].mxu1 %v7886_v48 }
 0x293   :  { %6527 = vmatpush3.bf16.msra.mxu1 %v7924_v46  ;;  %5355 = vmatprep.mubr.msk.f32.mxu1 %vm7235_vm0, %v7236_v3 }
 0x294   :  { %6528 = vmatprep.subr.bf16.mxu1 %v7234_v0 }
 0x297   :  { %6530 = vmatpush3.bf16.msra.mxu1 %v7931_v17 }
 0x298   :  { %6531 = vmatprep.subr.bf16.mxu1 %v7234_v0 }
 0x29b   :  { %6533 = vmatpush3.bf16.msra.mxu1 %v7824_v29 }
 0x29c   :  { %6534 = vmatprep.subr.bf16.mxu1 %v7234_v0 }
 0x29f   :  { %6536 = vmatpush3.bf16.msra.mxu1 %v7828_v8 }
 0x2a0   :  { %6537 = vmatprep.subr.bf16.mxu1 %v7234_v0 }
 0x2a3   :  { %6539 = vmatpush3.bf16.msra.mxu1 %v7832_v38 }
 0x2a4   :  { %6540 = vmatprep.subr.bf16.mxu1 %v7234_v0 }
 0x2a7   :  { %6542 = vmatpush3.bf16.msra.mxu1 %v7836_v39 }
 0x2a8   :  { %6543 = vmatprep.subr.bf16.mxu1 %v7234_v0 }
 0x2ab   :  { %6545 = vmatpush3.bf16.msra.mxu1 %v7840_v51 }
 0x2ac   :  { %6546 = vmatprep.subr.bf16.mxu1 %v7234_v0 }
 0x2af   :  { %6548 = vmatpush3.bf16.msra.mxu1 %v7844_v54 }
 0x2b0   :  { %6549 = vmatprep.subr.bf16.mxu1 %v7234_v0 }
 0x2b2   :  { %5356 = vmatmul.mubr.f32.vlgmr.msra.gmra.mrb[4].mxu1 %v7889_v56  ;;  %v8000_v56 = vpack.c.bf16 %v856_v50, %v849_v49  ;;  %v8813_v49 = vand.u32 4294901760, %v7803_v45  ;;  %v8814_v50 = vand.u32 4294901760, %v7805_v53 }
 0x2b3   :  { %6551 = vmatpush3.bf16.msra.mxu1 %v7589_v4  ;;  %5390 = vmatprep.mubr.msk.f32.mxu1 %vm7235_vm0, %v7236_v3 }
 0x2b4   :  { %6552 = vmatprep.subr.bf16.mxu1 %v7234_v0  ;;  %v8032_v31 = vpack.c.bf16 %v8814_v50, %v8813_v49 }
 0x2b7   :  { %6554 = vmatpush3.bf16.msra.mxu1 %v7600_v6 }
 0x2b8   :  { %6555 = vmatprep.subr.bf16.mxu1 %v7234_v0 }
 0x2bb   :  { %6557 = vmatpush3.bf16.msra.mxu1 %v7668_v32 }
 0x2bc   :  { %6558 = vmatprep.subr.bf16.mxu1 %v7234_v0 }
 0x2bf   :  { %6560 = vmatpush3.bf16.msra.mxu1 %v7691_v55 }
 0x2c0   :  { %6561 = vmatprep.subr.bf16.mxu1 %v7234_v0 }
 0x2c3   :  { %6563 = vmatpush3.bf16.msra.mxu1 %v7697_v2 }
 0x2c4   :  { %6564 = vmatprep.subr.bf16.mxu1 %v7234_v0 }
 0x2c7   :  { %6566 = vmatpush3.bf16.msra.mxu1 %v7710_v42 }
 0x2c8   :  { %6567 = vmatprep.subr.bf16.mxu1 %v7234_v0 }
 0x2cb   :  { %6569 = vmatpush3.bf16.msra.mxu1 %v7722_v15 }
 0x2cc   :  { %6570 = vmatprep.subr.bf16.mxu1 %v7234_v0 }
 0x2cf   :  { %6572 = vmatpush3.bf16.msra.mxu1 %v7728_v59 }
 0x2d0   :  { %6573 = vmatprep.subr.bf16.mxu1 %v7234_v0 }
 0x2d2   :  { %5391 = vmatmul.mubr.f32.vlgmr.msra.gmra.mrb[6].mxu1 %v796_v44  ;;  %v7992_v44 = vpack.c.bf16 %v842_v13, %v835_v12  ;;  %v8016_v12 = vpack.c.bf16 %v8810_v63, %v877_v43  ;;  %v8811_v13 = vand.u32 4294901760, %v7792_v60 }
 0x2d3   :  { %6575 = vmatpush3.bf16.msra.mxu1 %v7972_v40  ;;  %5425 = vmatprep.mubr.msk.f32.mxu1 %vm7235_vm0, %v7236_v3 }
 0x2d4   :  { %6576 = vmatprep.subr.bf16.mxu1 %v7234_v0  ;;  %v8024_v27 = vpack.c.bf16 %v8812_v26, %v8811_v13 }
 0x2d7   :  { %6578 = vmatpush3.bf16.msra.mxu1 %v7982_v57 }
 0x2d8   :  { %6579 = vmatprep.subr.bf16.mxu1 %v7234_v0 }
 0x2db   :  { %6581 = vmatpush3.bf16.msra.mxu1 %v7992_v44 }
 0x2dc   :  { %6582 = vmatprep.subr.bf16.mxu1 %v7234_v0 }
 0x2df   :  { %6584 = vmatpush3.bf16.msra.mxu1 %v8000_v56 }
 0x2e0   :  { %6585 = vmatprep.subr.bf16.mxu1 %v7234_v0 }
 0x2e3   :  { %6587 = vmatpush3.bf16.msra.mxu1 %v8008_v62 }
 0x2e4   :  { %6588 = vmatprep.subr.bf16.mxu1 %v7234_v0 }
 0x2e7   :  { %6590 = vmatpush3.bf16.msra.mxu1 %v8016_v12 }
 0x2e8   :  { %6591 = vmatprep.subr.bf16.mxu1 %v7234_v0 }
 0x2eb   :  { %6593 = vmatpush3.bf16.msra.mxu1 %v8024_v27 }
 0x2ec   :  { %6594 = vmatprep.subr.bf16.mxu1 %v7234_v0 }
 0x2ef   :  { %6596 = vmatpush3.bf16.msra.mxu1 %v8032_v31 }
 0x2f0   :  { %6597 = vmatprep.subr.bf16.mxu1 %v7234_v0 }
 0x2f2   :  { %5426 = vmatmul.mubr.f32.vlgmr.msra.gmra.mrb[8].mxu1 %v7886_v48 }
 0x2f3   :  { %6599 = vmatpush3.bf16.msra.mxu1 %v7589_v4  ;;  %5460 = vmatprep.mubr.msk.f32.mxu1 %vm7235_vm0, %v7236_v3 }
 0x2f4   :  { %6600 = vmatprep.subr.bf16.mxu1 %v7234_v0 }
 0x2f7   :  { %6602 = vmatpush3.bf16.msra.mxu1 %v7600_v6 }
 0x2f8   :  { %6603 = vmatprep.subr.bf16.mxu1 %v7234_v0 }
 0x2fb   :  { %6605 = vmatpush3.bf16.msra.mxu1 %v7668_v32 }
 0x2fc   :  { %6606 = vmatprep.subr.bf16.mxu1 %v7234_v0 }
 0x2ff   :  { %6608 = vmatpush3.bf16.msra.mxu1 %v7691_v55 }
 0x300   :  { %6609 = vmatprep.subr.bf16.mxu1 %v7234_v0 }
 0x303   :  { %6611 = vmatpush3.bf16.msra.mxu1 %v7697_v2 }
 0x304   :  { %6612 = vmatprep.subr.bf16.mxu1 %v7234_v0 }
 0x307   :  { %6614 = vmatpush3.bf16.msra.mxu1 %v7710_v42 }
 0x308   :  { %6615 = vmatprep.subr.bf16.mxu1 %v7234_v0 }
 0x30b   :  { %6617 = vmatpush3.bf16.msra.mxu1 %v7722_v15 }
 0x30c   :  { %6618 = vmatprep.subr.bf16.mxu1 %v7234_v0 }
 0x30f   :  { %6620 = vmatpush3.bf16.msra.mxu1 %v7728_v59 }
 0x310   :  { %6621 = vmatprep.subr.bf16.mxu1 %v7234_v0 }
 0x312   :  { %5461 = vmatmul.mubr.f32.vlgmr.msra.gmra.mrb[10].mxu1 %v7886_v48  ;;  %v4415_v48 = vsel %vm1355_vm2, 1.0, %v7236_v3 }
 0x313   :  { %6623 = vmatpush3.bf16.msra.mxu1 %v7589_v4  ;;  %5495 = vmatprep.mubr.msk.f32.mxu1 %vm7235_vm0, %v7236_v3 }
 0x314   :  { %6624 = vmatprep.subr.bf16.mxu1 %v7234_v0 }
 0x317   :  { %6626 = vmatpush3.bf16.msra.mxu1 %v7600_v6 }
 0x318   :  { %6627 = vmatprep.subr.bf16.mxu1 %v7234_v0 }
 0x31b   :  { %6629 = vmatpush3.bf16.msra.mxu1 %v7668_v32 }
 0x31c   :  { %6630 = vmatprep.subr.bf16.mxu1 %v7234_v0 }
 0x31f   :  { %6632 = vmatpush3.bf16.msra.mxu1 %v7691_v55 }
 0x320   :  { %6633 = vmatprep.subr.bf16.mxu1 %v7234_v0 }
 0x323   :  { %6635 = vmatpush3.bf16.msra.mxu1 %v7697_v2 }
 0x324   :  { %6636 = vmatprep.subr.bf16.mxu1 %v7234_v0 }
 0x327   :  { %6638 = vmatpush3.bf16.msra.mxu1 %v7710_v42 }
 0x328   :  { %6639 = vmatprep.subr.bf16.mxu1 %v7234_v0 }
 0x32b   :  { %6641 = vmatpush3.bf16.msra.mxu1 %v7722_v15 }
 0x32c   :  { %6642 = vmatprep.subr.bf16.mxu1 %v7234_v0 }
 0x32f   :  { %6644 = vmatpush3.bf16.msra.mxu1 %v7728_v59 }
 0x330   :  { %6645 = vmatprep.subr.bf16.mxu1 %v7234_v0 }
 0x345   :  { %v800_v5 = vpop.f32.mrb[0].mxu1 }
 0x346   :  { %v5287_v7 = vpop.f32.mrb[1].mxu1 }
 0x365   :  { %v951_v25 = vpop.f32.mrb[2].mxu1 }
 0x366   :  { %v952_v11 = vadd.f32 %v951_v25, %v800_v5  ;;  %v5322_v16 = vpop.f32.mrb[3].mxu1 }
 0x385   :  { %v1055_v43 = vpop.f32.mrb[4].mxu1 }
 0x386   :  { %v1056_v60 = vadd.f32 %v1055_v43, %v952_v11  ;;  %v5357_v61 = vpop.f32.mrb[5].mxu1 }
 0x3a5   :  { %v1144_v45 = vpop.f32.mrb[6].mxu1 }
 0x3a6   :  { %v1145_v53 = vadd.f32 %v1144_v45, %v1056_v60  ;;  %v5392_v24 = vpop.f32.mrb[7].mxu1 }
 0x3c5   :  { %v1263_v58 = vpop.f32.mrb[8].mxu1 }
 0x3c6   :  { %v1264_v41 = vadd.f32 %v1263_v58, %v1145_v53  ;;  %v5427_v1 = vpop.f32.mrb[9].mxu1 }
 0x3e5   :  { %v1350_v9 = vpop.f32.mrb[10].mxu1 }
 0x3e6   :  { %v1351_v33 = vadd.f32 %v1350_v9, %v1264_v41  ;;  %v5462_v19 = vpop.f32.mrb[11].mxu1 }
 0x3e8   :  { %v8076_v21 = vadd.f32 %v7849_v18, %v1351_v33  ;;  %v4416_v33 = vsel %vm2002_vm3, 1.0, %v7236_v3 }
 0x3ea   :  { %7223 = vtanh.f32 %v8076_v21 }
 0x3f4   :  { %v7224_v35 = vpop.eup %7223 }
 0x3f5   :  { %v1359_v22 = vmul.f32 %v7224_v35, %v4415_v48 }
 0x3f7   :  { %v8081_v34 = vand.u32 4294901760, %v1359_v22 }
 0x3f9   :  { %v1442_v36 = vsub.f32 %v1359_v22, %v8081_v34 }
 0x3fb   :  { %v1443_v63 = vand.u32 4294901760, %v1442_v36 }
 0x3fd   :  { %v1444_v13 = vsub.f32 %v1442_v36, %v1443_v63 }
 0x3ff   :  { %v1445_v26 = vand.u32 4294901760, %v1444_v13 }
 0x401   :  { %5496 = vmatmul.mubr.f32.vlgmr.msra.gmra.mrb[12].mxu1 %v1445_v26 }
 0x402   :  { %6647 = vmatpush3.bf16.msra.mxu1 %v7901_v10  ;;  %5530 = vmatprep.mubr.msk.f32.mxu1 %vm7235_vm0, %v7236_v3 }
 0x403   :  { %6648 = vmatprep.subr.bf16.mxu1 %v7234_v0 }
 0x406   :  { %6650 = vmatpush3.bf16.msra.mxu1 %v7904_v37 }
 0x407   :  { %6651 = vmatprep.subr.bf16.mxu1 %v7234_v0 }
 0x40a   :  { %6653 = vmatpush3.bf16.msra.mxu1 %v7755_v52 }
 0x40b   :  { %6654 = vmatprep.subr.bf16.mxu1 %v7234_v0 }
 0x40e   :  { %6656 = vmatpush3.bf16.msra.mxu1 %v7780_v30 }
 0x40f   :  { %6657 = vmatprep.subr.bf16.mxu1 %v7234_v0 }
 0x412   :  { %6659 = vmatpush3.bf16.msra.mxu1 %v7784_v47 }
 0x413   :  { %6660 = vmatprep.subr.bf16.mxu1 %v7234_v0 }
 0x416   :  { %6662 = vmatpush3.bf16.msra.mxu1 %v7798_v20 }
 0x417   :  { %6663 = vmatprep.subr.bf16.mxu1 %v7234_v0 }
 0x41a   :  { %6665 = vmatpush3.bf16.msra.mxu1 %v7818_v14 }
 0x41b   :  { %6666 = vmatprep.subr.bf16.mxu1 %v7234_v0 }
 0x41e   :  { %6668 = vmatpush3.bf16.msra.mxu1 %v7820_v28 }
 0x41f   :  { %6669 = vmatprep.subr.bf16.mxu1 %v7234_v0 }
 0x421   :  { %5531 = vmatmul.mubr.f32.vlgmr.msra.gmra.mrb[14].mxu1 %v8081_v34 }
 0x422   :  { %6671 = vmatpush3.bf16.msra.mxu1 %v7924_v46  ;;  %5565 = vmatprep.mubr.msk.f32.mxu1 %vm7235_vm0, %v7236_v3 }
 0x423   :  { %6672 = vmatprep.subr.bf16.mxu1 %v7234_v0 }
 0x426   :  { %6674 = vmatpush3.bf16.msra.mxu1 %v7931_v17 }
 0x427   :  { %6675 = vmatprep.subr.bf16.mxu1 %v7234_v0 }
 0x42a   :  { %6677 = vmatpush3.bf16.msra.mxu1 %v7824_v29 }
 0x42b   :  { %6678 = vmatprep.subr.bf16.mxu1 %v7234_v0 }
 0x42e   :  { %6680 = vmatpush3.bf16.msra.mxu1 %v7828_v8 }
 0x42f   :  { %6681 = vmatprep.subr.bf16.mxu1 %v7234_v0 }
 0x432   :  { %6683 = vmatpush3.bf16.msra.mxu1 %v7832_v38 }
 0x433   :  { %6684 = vmatprep.subr.bf16.mxu1 %v7234_v0 }
 0x436   :  { %6686 = vmatpush3.bf16.msra.mxu1 %v7836_v39 }
 0x437   :  { %6687 = vmatprep.subr.bf16.mxu1 %v7234_v0 }
 0x43a   :  { %6689 = vmatpush3.bf16.msra.mxu1 %v7840_v51 }
 0x43b   :  { %6690 = vmatprep.subr.bf16.mxu1 %v7234_v0 }
 0x43e   :  { %6692 = vmatpush3.bf16.msra.mxu1 %v7844_v54 }
 0x43f   :  { %6693 = vmatprep.subr.bf16.mxu1 %v7234_v0 }
 0x441   :  { %5566 = vmatmul.mubr.f32.vlgmr.msra.gmra.mrb[16].mxu1 %v1442_v36 }
 0x442   :  { %6695 = vmatpush3.bf16.msra.mxu1 %v7589_v4  ;;  %5600 = vmatprep.mubr.msk.f32.mxu1 %vm7235_vm0, %v7236_v3 }
 0x443   :  { %6696 = vmatprep.subr.bf16.mxu1 %v7234_v0 }
 0x446   :  { %6698 = vmatpush3.bf16.msra.mxu1 %v7600_v6 }
 0x447   :  { %6699 = vmatprep.subr.bf16.mxu1 %v7234_v0 }
 0x44a   :  { %6701 = vmatpush3.bf16.msra.mxu1 %v7668_v32 }
 0x44b   :  { %6702 = vmatprep.subr.bf16.mxu1 %v7234_v0 }
 0x44e   :  { %6704 = vmatpush3.bf16.msra.mxu1 %v7691_v55 }
 0x44f   :  { %6705 = vmatprep.subr.bf16.mxu1 %v7234_v0 }
 0x452   :  { %6707 = vmatpush3.bf16.msra.mxu1 %v7697_v2 }
 0x453   :  { %6708 = vmatprep.subr.bf16.mxu1 %v7234_v0 }
 0x456   :  { %6710 = vmatpush3.bf16.msra.mxu1 %v7710_v42 }
 0x457   :  { %6711 = vmatprep.subr.bf16.mxu1 %v7234_v0 }
 0x45a   :  { %6713 = vmatpush3.bf16.msra.mxu1 %v7722_v15 }
 0x45b   :  { %6714 = vmatprep.subr.bf16.mxu1 %v7234_v0 }
 0x45e   :  { %6716 = vmatpush3.bf16.msra.mxu1 %v7728_v59 }
 0x45f   :  { %6717 = vmatprep.subr.bf16.mxu1 %v7234_v0 }
 0x461   :  { %5601 = vmatmul.mubr.f32.vlgmr.msra.gmra.mrb[18].mxu1 %v1443_v63 }
 0x462   :  { %6719 = vmatpush3.bf16.msra.mxu1 %v7972_v40  ;;  %5635 = vmatprep.mubr.msk.f32.mxu1 %vm7235_vm0, %v7236_v3 }
 0x463   :  { %6720 = vmatprep.subr.bf16.mxu1 %v7234_v0 }
 0x466   :  { %6722 = vmatpush3.bf16.msra.mxu1 %v7982_v57 }
 0x467   :  { %6723 = vmatprep.subr.bf16.mxu1 %v7234_v0 }
 0x46a   :  { %6725 = vmatpush3.bf16.msra.mxu1 %v7992_v44 }
 0x46b   :  { %6726 = vmatprep.subr.bf16.mxu1 %v7234_v0 }
 0x46e   :  { %6728 = vmatpush3.bf16.msra.mxu1 %v8000_v56 }
 0x46f   :  { %6729 = vmatprep.subr.bf16.mxu1 %v7234_v0 }
 0x472   :  { %6731 = vmatpush3.bf16.msra.mxu1 %v8008_v62 }
 0x473   :  { %6732 = vmatprep.subr.bf16.mxu1 %v7234_v0 }
 0x476   :  { %6734 = vmatpush3.bf16.msra.mxu1 %v8016_v12 }
 0x477   :  { %6735 = vmatprep.subr.bf16.mxu1 %v7234_v0 }
 0x47a   :  { %6737 = vmatpush3.bf16.msra.mxu1 %v8024_v27 }
 0x47b   :  { %6738 = vmatprep.subr.bf16.mxu1 %v7234_v0 }
 0x47e   :  { %6740 = vmatpush3.bf16.msra.mxu1 %v8032_v31 }
 0x47f   :  { %6741 = vmatprep.subr.bf16.mxu1 %v7234_v0 }
 0x481   :  { %5636 = vmatmul.mubr.f32.vlgmr.msra.gmra.mrb[20].mxu1 %v8081_v34 }
 0x482   :  { %6743 = vmatpush3.bf16.msra.mxu1 %v7589_v4  ;;  %5670 = vmatprep.mubr.msk.f32.mxu1 %vm7235_vm0, %v7236_v3 }
 0x483   :  { %6744 = vmatprep.subr.bf16.mxu1 %v7234_v0 }
 0x486   :  { %6746 = vmatpush3.bf16.msra.mxu1 %v7600_v6 }
 0x487   :  { %6747 = vmatprep.subr.bf16.mxu1 %v7234_v0 }
 0x48a   :  { %6749 = vmatpush3.bf16.msra.mxu1 %v7668_v32 }
 0x48b   :  { %6750 = vmatprep.subr.bf16.mxu1 %v7234_v0 }
 0x48e   :  { %6752 = vmatpush3.bf16.msra.mxu1 %v7691_v55 }
 0x48f   :  { %6753 = vmatprep.subr.bf16.mxu1 %v7234_v0 }
 0x492   :  { %6755 = vmatpush3.bf16.msra.mxu1 %v7697_v2 }
 0x493   :  { %6756 = vmatprep.subr.bf16.mxu1 %v7234_v0 }
 0x496   :  { %6758 = vmatpush3.bf16.msra.mxu1 %v7710_v42 }
 0x497   :  { %6759 = vmatprep.subr.bf16.mxu1 %v7234_v0 }
 0x49a   :  { %6761 = vmatpush3.bf16.msra.mxu1 %v7722_v15 }
 0x49b   :  { %6762 = vmatprep.subr.bf16.mxu1 %v7234_v0 }
 0x49e   :  { %6764 = vmatpush3.bf16.msra.mxu1 %v7728_v59 }
 0x49f   :  { %6789 = vmatprep.subr.bf16.mxu1 %v7234_v0 }
 0x4a1   :  { %5671 = vmatmul.mubr.f32.vlgmr.msra.gmra.mrb[22].mxu1 %v8081_v34 }
 0x4a2   :  { %6791 = vmatpush3.bf16.msra.mxu1 %v7901_v10  ;;  %5740 = vmatprep.mubr.msk.f32.mxu1 %vm7235_vm0, %v7236_v3 }
 0x4a3   :  { %6792 = vmatprep.subr.bf16.mxu1 %v7234_v0 }
 0x4a6   :  { %6794 = vmatpush3.bf16.msra.mxu1 %v7904_v37 }
 0x4a7   :  { %6795 = vmatprep.subr.bf16.mxu1 %v7234_v0 }
 0x4aa   :  { %6797 = vmatpush3.bf16.msra.mxu1 %v7755_v52 }
 0x4ab   :  { %6798 = vmatprep.subr.bf16.mxu1 %v7234_v0 }
 0x4ae   :  { %6800 = vmatpush3.bf16.msra.mxu1 %v7780_v30 }
 0x4af   :  { %6801 = vmatprep.subr.bf16.mxu1 %v7234_v0 }
 0x4b2   :  { %6803 = vmatpush3.bf16.msra.mxu1 %v7784_v47 }
 0x4b3   :  { %6804 = vmatprep.subr.bf16.mxu1 %v7234_v0 }
 0x4b6   :  { %6806 = vmatpush3.bf16.msra.mxu1 %v7798_v20 }
 0x4b7   :  { %6807 = vmatprep.subr.bf16.mxu1 %v7234_v0 }
 0x4ba   :  { %6809 = vmatpush3.bf16.msra.mxu1 %v7818_v14 }
 0x4bb   :  { %6810 = vmatprep.subr.bf16.mxu1 %v7234_v0 }
 0x4be   :  { %6812 = vmatpush3.bf16.msra.mxu1 %v7820_v28 }
 0x4bf   :  { %6837 = vmatprep.subr.bf16.mxu1 %v7234_v0 }
 0x4d4   :  { %v1447_v18 = vpop.f32.mrb[12].mxu1 }
 0x4d5   :  { %v5497_v49 = vpop.f32.mrb[13].mxu1 }
 0x4f4   :  { %v1598_v50 = vpop.f32.mrb[14].mxu1 }
 0x4f5   :  { %v1599_v5 = vadd.f32 %v1598_v50, %v1447_v18  ;;  %v5532_v7 = vpop.f32.mrb[15].mxu1 }
 0x514   :  { %v1702_v25 = vpop.f32.mrb[16].mxu1 }
 0x515   :  { %v1703_v11 = vadd.f32 %v1702_v25, %v1599_v5  ;;  %v5567_v16 = vpop.f32.mrb[17].mxu1 }
 0x516   :  { %v4417_v16 = vsel %vm2649_vm4, 1.0, %v7236_v3 }
 0x534   :  { %v1791_v43 = vpop.f32.mrb[18].mxu1 }
 0x535   :  { %v1792_v60 = vadd.f32 %v1791_v43, %v1703_v11  ;;  %v5602_v61 = vpop.f32.mrb[19].mxu1 }
 0x554   :  { %v1910_v45 = vpop.f32.mrb[20].mxu1 }
 0x555   :  { %v1911_v53 = vadd.f32 %v1910_v45, %v1792_v60  ;;  %v5637_v24 = vpop.f32.mrb[21].mxu1 }
 0x574   :  { %v1997_v58 = vpop.f32.mrb[22].mxu1 }
 0x575   :  { %v1998_v41 = vadd.f32 %v1997_v58, %v1911_v53  ;;  %v5672_v1 = vpop.f32.mrb[23].mxu1 }
 0x577   :  { %v8196_v9 = vadd.f32 %v1998_v41, %v8076_v21 }
 0x579   :  { %7225 = vtanh.f32 %v8196_v9 }
 0x583   :  { %v7226_v19 = vpop.eup %7225 }
 0x584   :  { %v2006_v48 = vmul.f32 %v7226_v19, %v4416_v33  ;;  %v8465_v19 = vld [vmem:[%s8795_s2 + $0x30] sm:$0xff] }
 0x586   :  { %v8201_v35 = vand.u32 4294901760, %v2006_v48 }
 0x588   :  { %v2089_v22 = vsub.f32 %v2006_v48, %v8201_v35  ;;  %5741 = vmatmul.mubr.f32.vlgmr.msra.gmra.mrb[24].mxu1 %v8201_v35  ;;  %v8470_v48 = vld [vmem:[%s8795_s2 + $0x38] sm:$0xff] }
 0x589   :  { %6839 = vmatpush3.bf16.msra.mxu1 %v7589_v4  ;;  %5810 = vmatprep.mubr.msk.f32.mxu1 %vm7235_vm0, %v7236_v3 }
 0x58a   :  { %6840 = vmatprep.subr.bf16.mxu1 %v7234_v0  ;;  %v2090_v21 = vand.u32 4294901760, %v2089_v22 }
 0x58c   :  { %v2091_v34 = vsub.f32 %v2089_v22, %v2090_v21 }
 0x58d   :  { %6842 = vmatpush3.bf16.msra.mxu1 %v7600_v6 }
 0x58e   :  { %6843 = vmatprep.subr.bf16.mxu1 %v7234_v0  ;;  %v2092_v36 = vand.u32 4294901760, %v2091_v34 }
 0x590   :  { %5706 = vmatmul.mubr.f32.vlgmr.msra.gmra.mrb[2].mxu0 %v2092_v36  ;;  %v3332_v36 = vand.u32 4294901760, %v8465_v19 }
 0x591   :  { %6815 = vmatpush3.bf16.msra.mxu0 %v7924_v46  ;;  %6845 = vmatpush3.bf16.msra.mxu1 %v7668_v32 }
 0x592   :  { %6816 = vmatprep.subr.bf16.mxu0 %v7234_v0  ;;  %6846 = vmatprep.subr.bf16.mxu1 %v7234_v0 }
 0x593   :  { %5775 = vmatprep.mubr.msk.f32.mxu0 %vm7235_vm0, %v7236_v3 }
 0x595   :  { %6818 = vmatpush3.bf16.msra.mxu0 %v7931_v17  ;;  %6848 = vmatpush3.bf16.msra.mxu1 %v7691_v55 }
 0x596   :  { %6819 = vmatprep.subr.bf16.mxu0 %v7234_v0  ;;  %6849 = vmatprep.subr.bf16.mxu1 %v7234_v0 }
 0x599   :  { %6821 = vmatpush3.bf16.msra.mxu0 %v7824_v29  ;;  %6851 = vmatpush3.bf16.msra.mxu1 %v7697_v2 }
 0x59a   :  { %6822 = vmatprep.subr.bf16.mxu0 %v7234_v0  ;;  %6852 = vmatprep.subr.bf16.mxu1 %v7234_v0 }
 0x59d   :  { %6824 = vmatpush3.bf16.msra.mxu0 %v7828_v8  ;;  %6854 = vmatpush3.bf16.msra.mxu1 %v7710_v42 }
 0x59e   :  { %6825 = vmatprep.subr.bf16.mxu0 %v7234_v0  ;;  %6855 = vmatprep.subr.bf16.mxu1 %v7234_v0 }
 0x5a1   :  { %6827 = vmatpush3.bf16.msra.mxu0 %v7832_v38  ;;  %6857 = vmatpush3.bf16.msra.mxu1 %v7722_v15 }
 0x5a2   :  { %6828 = vmatprep.subr.bf16.mxu0 %v7234_v0  ;;  %6858 = vmatprep.subr.bf16.mxu1 %v7234_v0 }
 0x5a5   :  { %6830 = vmatpush3.bf16.msra.mxu0 %v7836_v39  ;;  %6860 = vmatpush3.bf16.msra.mxu1 %v7728_v59 }
 0x5a6   :  { %6831 = vmatprep.subr.bf16.mxu0 %v7234_v0  ;;  %6885 = vmatprep.subr.bf16.mxu1 %v7234_v0 }
 0x5a8   :  { %5811 = vmatmul.mubr.f32.vlgmr.msra.gmra.mrb[26].mxu1 %v2090_v21 }
 0x5a9   :  { %6833 = vmatpush3.bf16.msra.mxu0 %v7840_v51  ;;  %6887 = vmatpush3.bf16.msra.mxu1 %v7589_v4 }
 0x5aa   :  { %6834 = vmatprep.subr.bf16.mxu0 %v7234_v0  ;;  %6888 = vmatprep.subr.bf16.mxu1 %v7234_v0 }
 0x5ab   :  { %5880 = vmatprep.mubr.msk.f32.mxu1 %vm7235_vm0, %v7236_v3 }
 0x5ad   :  { %6836 = vmatpush3.bf16.msra.mxu0 %v7844_v54  ;;  %6890 = vmatpush3.bf16.msra.mxu1 %v7600_v6 }
 0x5ae   :  { %6861 = vmatprep.subr.bf16.mxu0 %v7234_v0  ;;  %6891 = vmatprep.subr.bf16.mxu1 %v7234_v0 }
 0x5b0   :  { %5776 = vmatmul.mubr.f32.vlgmr.msra.gmra.mrb[4].mxu0 %v2089_v22 }
 0x5b1   :  { %6863 = vmatpush3.bf16.msra.mxu0 %v7972_v40  ;;  %6893 = vmatpush3.bf16.msra.mxu1 %v7668_v32 }
 0x5b2   :  { %6864 = vmatprep.subr.bf16.mxu0 %v7234_v0  ;;  %6894 = vmatprep.subr.bf16.mxu1 %v7234_v0 }
 0x5b3   :  { %5845 = vmatprep.mubr.msk.f32.mxu0 %vm7235_vm0, %v7236_v3 }
 0x5b5   :  { %6866 = vmatpush3.bf16.msra.mxu0 %v7982_v57  ;;  %6896 = vmatpush3.bf16.msra.mxu1 %v7691_v55 }
 0x5b6   :  { %6867 = vmatprep.subr.bf16.mxu0 %v7234_v0  ;;  %6897 = vmatprep.subr.bf16.mxu1 %v7234_v0 }
 0x5b9   :  { %6869 = vmatpush3.bf16.msra.mxu0 %v7992_v44  ;;  %6899 = vmatpush3.bf16.msra.mxu1 %v7697_v2 }
 0x5ba   :  { %6870 = vmatprep.subr.bf16.mxu0 %v7234_v0  ;;  %6900 = vmatprep.subr.bf16.mxu1 %v7234_v0 }
 0x5bd   :  { %6872 = vmatpush3.bf16.msra.mxu0 %v8000_v56  ;;  %6902 = vmatpush3.bf16.msra.mxu1 %v7710_v42 }
 0x5be   :  { %6873 = vmatprep.subr.bf16.mxu0 %v7234_v0  ;;  %6903 = vmatprep.subr.bf16.mxu1 %v7234_v0 }
 0x5c1   :  { %6875 = vmatpush3.bf16.msra.mxu0 %v8008_v62  ;;  %6905 = vmatpush3.bf16.msra.mxu1 %v7722_v15 }
 0x5c2   :  { %6876 = vmatprep.subr.bf16.mxu0 %v7234_v0  ;;  %6906 = vmatprep.subr.bf16.mxu1 %v7234_v0 }
 0x5c5   :  { %6878 = vmatpush3.bf16.msra.mxu0 %v8016_v12  ;;  %6908 = vmatpush3.bf16.msra.mxu1 %v7728_v59 }
 0x5c6   :  { %6879 = vmatprep.subr.bf16.mxu0 %v7234_v0  ;;  %6933 = vmatprep.subr.bf16.mxu1 %v7234_v0 }
 0x5c8   :  { %5881 = vmatmul.mubr.f32.vlgmr.msra.gmra.mrb[28].mxu1 %v8201_v35 }
 0x5c9   :  { %6881 = vmatpush3.bf16.msra.mxu0 %v8024_v27  ;;  %6935 = vmatpush3.bf16.msra.mxu1 %v7901_v10 }
 0x5ca   :  { %6882 = vmatprep.subr.bf16.mxu0 %v7234_v0  ;;  %6936 = vmatprep.subr.bf16.mxu1 %v7234_v0 }
 0x5cb   :  { %5950 = vmatprep.mubr.msk.f32.mxu1 %vm7235_vm0, %v7236_v3 }
 0x5cd   :  { %6884 = vmatpush3.bf16.msra.mxu0 %v8032_v31  ;;  %6938 = vmatpush3.bf16.msra.mxu1 %v7904_v37 }
 0x5ce   :  { %6909 = vmatprep.subr.bf16.mxu0 %v7234_v0  ;;  %6939 = vmatprep.subr.bf16.mxu1 %v7234_v0 }
 0x5d0   :  { %5846 = vmatmul.mubr.f32.vlgmr.msra.gmra.mrb[6].mxu0 %v8201_v35 }
 0x5d1   :  { %6911 = vmatpush3.bf16.msra.mxu0 %v7589_v4  ;;  %6941 = vmatpush3.bf16.msra.mxu1 %v7755_v52 }
 0x5d2   :  { %6912 = vmatprep.subr.bf16.mxu0 %v7234_v0  ;;  %6942 = vmatprep.subr.bf16.mxu1 %v7234_v0 }
 0x5d3   :  { %5915 = vmatprep.mubr.msk.f32.mxu0 %vm7235_vm0, %v7236_v3 }
 0x5d5   :  { %6914 = vmatpush3.bf16.msra.mxu0 %v7600_v6  ;;  %6944 = vmatpush3.bf16.msra.mxu1 %v7780_v30 }
 0x5d6   :  { %6915 = vmatprep.subr.bf16.mxu0 %v7234_v0  ;;  %6945 = vmatprep.subr.bf16.mxu1 %v7234_v0 }
 0x5d9   :  { %6917 = vmatpush3.bf16.msra.mxu0 %v7668_v32  ;;  %6947 = vmatpush3.bf16.msra.mxu1 %v7784_v47 }
 0x5da   :  { %6918 = vmatprep.subr.bf16.mxu0 %v7234_v0  ;;  %6948 = vmatprep.subr.bf16.mxu1 %v7234_v0 }
 0x5dd   :  { %6920 = vmatpush3.bf16.msra.mxu0 %v7691_v55  ;;  %6950 = vmatpush3.bf16.msra.mxu1 %v7798_v20 }
 0x5de   :  { %6921 = vmatprep.subr.bf16.mxu0 %v7234_v0  ;;  %6951 = vmatprep.subr.bf16.mxu1 %v7234_v0 }
 0x5e1   :  { %6923 = vmatpush3.bf16.msra.mxu0 %v7697_v2  ;;  %6953 = vmatpush3.bf16.msra.mxu1 %v7818_v14 }
 0x5e2   :  { %6924 = vmatprep.subr.bf16.mxu0 %v7234_v0  ;;  %6954 = vmatprep.subr.bf16.mxu1 %v7234_v0 }
 0x5e5   :  { %6926 = vmatpush3.bf16.msra.mxu0 %v7710_v42  ;;  %6956 = vmatpush3.bf16.msra.mxu1 %v7820_v28 }
 0x5e6   :  { %6927 = vmatprep.subr.bf16.mxu0 %v7234_v0  ;;  %6981 = vmatprep.subr.bf16.mxu1 %v7234_v0 }
 0x5e9   :  { %6929 = vmatpush3.bf16.msra.mxu0 %v7722_v15 }
 0x5ea   :  { %6930 = vmatprep.subr.bf16.mxu0 %v7234_v0 }
 0x5ed   :  { %6932 = vmatpush3.bf16.msra.mxu0 %v7728_v59 }
 0x5ee   :  { %6957 = vmatprep.subr.bf16.mxu0 %v7234_v0 }
 0x65b   :  { %v2245_v52 = vpop.f32.mrb[24].mxu1 }
 0x65c   :  { %v5742_v30 = vpop.f32.mrb[25].mxu1 }
 0x663   :  { %v2094_v47 = vpop.f32.mrb[2].mxu0 }
 0x664   :  { %v2246_v10 = vadd.f32 %v2245_v52, %v2094_v47  ;;  %v5707_v20 = vpop.f32.mrb[3].mxu0  ;;  %v3335_v52 = vand.u32 4294901760, %v8470_v48 }
 0x665   :  { %v8485_v20 = vsub.f32 %v8465_v19, %v3332_v36 }
 0x67b   :  { %v2438_v14 = vpop.f32.mrb[26].mxu1 }
 0x67c   :  { %v5812_v37 = vpop.f32.mrb[27].mxu1 }
 0x67d   :  { %v8495_v37 = vld [vmem:[%s8795_s2 + $0x40] sm:$0xff] }
 0x683   :  { %v2349_v28 = vpop.f32.mrb[4].mxu0 }
 0x684   :  { %v2350_v63 = vadd.f32 %v2349_v28, %v2246_v10  ;;  %v5777_v13 = vpop.f32.mrb[5].mxu0  ;;  %v8500_v28 = vld [vmem:[%s8795_s2 + $0x48] sm:$0xff] }
 0x686   :  { %v2439_v26 = vadd.f32 %v2438_v14, %v2350_v63  ;;  %v8490_v14 = vsub.f32 %v8470_v48, %v3335_v52 }
 0x69b   :  { %v2644_v18 = vpop.f32.mrb[28].mxu1 }
 0x69c   :  { %v5882_v49 = vpop.f32.mrb[29].mxu1 }
 0x6a3   :  { %v2557_v50 = vpop.f32.mrb[6].mxu0 }
 0x6a4   :  { %v2558_v5 = vadd.f32 %v2557_v50, %v2439_v26  ;;  %v5847_v7 = vpop.f32.mrb[7].mxu0  ;;  %v3338_v26 = vand.u32 4294901760, %v8495_v37  ;;  %v3449_v50 = vand.u32 4294901760, %v8485_v20 }
 0x6a6   :  { %v2645_v25 = vadd.f32 %v2644_v18, %v2558_v5  ;;  %v3341_v18 = vand.u32 4294901760, %v8500_v28  ;;  %v3456_v5 = vand.u32 4294901760, %v8490_v14 }
 0x6a8   :  { %v8316_v11 = vadd.f32 %v2645_v25, %v8196_v9  ;;  %v8512_v25 = vsub.f32 %v8495_v37, %v3338_v26  ;;  %v8615_v19 = vpack.c.bf16 %v3341_v18, %v3338_v26 }
 0x6aa   :  { %7227 = vtanh.f32 %v8316_v11 }
 0x6b4   :  { %v7228_v43 = vpop.eup %7227 }
 0x6b5   :  { %v2653_v60 = vmul.f32 %v7228_v43, %v4417_v16  ;;  %v8517_v16 = vsub.f32 %v8500_v28, %v3341_v18  ;;  %v3450_v43 = vsub.f32 %v8485_v20, %v3449_v50 }
 0x6b7   :  { %v8321_v61 = vand.u32 4294901760, %v2653_v60 }
 0x6b9   :  { %v2736_v45 = vsub.f32 %v2653_v60, %v8321_v61  ;;  %5951 = vmatmul.mubr.f32.vlgmr.msra.gmra.mrb[30].mxu1 %v8321_v61  ;;  %v3457_v60 = vsub.f32 %v8490_v14, %v3456_v5 }
 0x6ba   :  { %6983 = vmatpush3.bf16.msra.mxu1 %v7589_v4  ;;  %6020 = vmatprep.mubr.msk.f32.mxu1 %vm7235_vm0, %v7236_v3 }
 0x6bb   :  { %6984 = vmatprep.subr.bf16.mxu1 %v7234_v0  ;;  %v2737_v53 = vand.u32 4294901760, %v2736_v45 }
 0x6bd   :  { %v2738_v24 = vsub.f32 %v2736_v45, %v2737_v53 }
 0x6be   :  { %6986 = vmatpush3.bf16.msra.mxu1 %v7600_v6 }
 0x6bf   :  { %6987 = vmatprep.subr.bf16.mxu1 %v7234_v0  ;;  %v2739_v23 = vand.u32 4294901760, %v2738_v24  ;;  %v3470_v24 = vand.u32 4294901760, %v8517_v16 }
 0x6c1   :  { %5916 = vmatmul.mubr.f32.vlgmr.msra.gmra.mrb[8].mxu0 %v2739_v23 }
 0x6c2   :  { %6959 = vmatpush3.bf16.msra.mxu0 %v7924_v46  ;;  %6989 = vmatpush3.bf16.msra.mxu1 %v7668_v32 }
 0x6c3   :  { %6960 = vmatprep.subr.bf16.mxu0 %v7234_v0  ;;  %6990 = vmatprep.subr.bf16.mxu1 %v7234_v0 }
 0x6c4   :  { %5985 = vmatprep.mubr.msk.f32.mxu0 %vm7235_vm0, %v7236_v3 }
 0x6c6   :  { %6962 = vmatpush3.bf16.msra.mxu0 %v7931_v17  ;;  %6992 = vmatpush3.bf16.msra.mxu1 %v7691_v55 }
 0x6c7   :  { %6963 = vmatprep.subr.bf16.mxu0 %v7234_v0  ;;  %6993 = vmatprep.subr.bf16.mxu1 %v7234_v0 }
 0x6ca   :  { %6965 = vmatpush3.bf16.msra.mxu0 %v7824_v29  ;;  %6995 = vmatpush3.bf16.msra.mxu1 %v7697_v2 }
 0x6cb   :  { %6966 = vmatprep.subr.bf16.mxu0 %v7234_v0  ;;  %6996 = vmatprep.subr.bf16.mxu1 %v7234_v0 }
 0x6ce   :  { %6968 = vmatpush3.bf16.msra.mxu0 %v7828_v8  ;;  %6998 = vmatpush3.bf16.msra.mxu1 %v7710_v42 }
 0x6cf   :  { %6969 = vmatprep.subr.bf16.mxu0 %v7234_v0  ;;  %6999 = vmatprep.subr.bf16.mxu1 %v7234_v0 }
 0x6d2   :  { %6971 = vmatpush3.bf16.msra.mxu0 %v7832_v38  ;;  %7001 = vmatpush3.bf16.msra.mxu1 %v7722_v15 }
 0x6d3   :  { %6972 = vmatprep.subr.bf16.mxu0 %v7234_v0  ;;  %7002 = vmatprep.subr.bf16.mxu1 %v7234_v0 }
 0x6d6   :  { %6974 = vmatpush3.bf16.msra.mxu0 %v7836_v39  ;;  %7004 = vmatpush3.bf16.msra.mxu1 %v7728_v59 }
 0x6d7   :  { %6975 = vmatprep.subr.bf16.mxu0 %v7234_v0  ;;  %7029 = vmatprep.subr.bf16.mxu1 %v7234_v0 }
 0x6d9   :  { %6021 = vmatmul.mubr.f32.vlgmr.msra.gmra.mrb[32].mxu1 %v2737_v53  ;;  %v3463_v53 = vand.u32 4294901760, %v8512_v25 }
 0x6da   :  { %6977 = vmatpush3.bf16.msra.mxu0 %v7840_v51  ;;  %7031 = vmatpush3.bf16.msra.mxu1 %v7589_v4  ;;  %v3297_v4 = vld [vmem:[%s8795_s2] sm:$0xff]  ;;  %v3299_v51 = vld [vmem:[%s8795_s2 + $0x10] sm:$0xff] }
 0x6db   :  { %6978 = vmatprep.subr.bf16.mxu0 %v7234_v0  ;;  %7032 = vmatprep.subr.bf16.mxu1 %v7234_v0  ;;  %v3320_v46 = vand.u32 4294901760, %v3299_v51 }
 0x6dc   :  { %6090 = vmatprep.mubr.msk.f32.mxu1 %vm7235_vm0, %v7236_v3 }
 0x6de   :  { %6980 = vmatpush3.bf16.msra.mxu0 %v7844_v54  ;;  %7034 = vmatpush3.bf16.msra.mxu1 %v7600_v6  ;;  %v3298_v6 = vld [vmem:[%s8795_s2 + $0x8] sm:$0xff]  ;;  %v3300_v54 = vld [vmem:[%s8795_s2 + $0x18] sm:$0xff] }
 0x6df   :  { %7005 = vmatprep.subr.bf16.mxu0 %v7234_v0  ;;  %7035 = vmatprep.subr.bf16.mxu1 %v7234_v0  ;;  %v3323_v17 = vand.u32 4294901760, %v3300_v54 }
 0x6e1   :  { %5986 = vmatmul.mubr.f32.vlgmr.msra.gmra.mrb[10].mxu0 %v2736_v45  ;;  %v8534_v45 = vld [vmem:[%s8795_s2 + $0x58] sm:$0xff] }
 0x6e2   :  { %7007 = vmatpush3.bf16.msra.mxu0 %v7972_v40  ;;  %7037 = vmatpush3.bf16.msra.mxu1 %v7668_v32  ;;  %v3314_v32 = vand.u32 4294901760, %v3297_v4 }
 0x6e3   :  { %7008 = vmatprep.subr.bf16.mxu0 %v7234_v0  ;;  %7038 = vmatprep.subr.bf16.mxu1 %v7234_v0 }
 0x6e4   :  { %6055 = vmatprep.mubr.msk.f32.mxu0 %vm7235_vm0, %v7236_v3 }
 0x6e6   :  { %7010 = vmatpush3.bf16.msra.mxu0 %v7982_v57  ;;  %7040 = vmatpush3.bf16.msra.mxu1 %v7691_v55  ;;  %v3317_v55 = vand.u32 4294901760, %v3298_v6  ;;  %v8427_v57 = vsub.f32 %v3299_v51, %v3320_v46 }
 0x6e7   :  { %7011 = vmatprep.subr.bf16.mxu0 %v7234_v0  ;;  %7041 = vmatprep.subr.bf16.mxu1 %v7234_v0 }
 0x6e8   :  { %v8505_v49 = vpack.c.bf16 %v3317_v55, %v3314_v32 }
 0x6ea   :  { %7013 = vmatpush3.bf16.msra.mxu0 %v7992_v44  ;;  %7043 = vmatpush3.bf16.msra.mxu1 %v7697_v2  ;;  %v8409_v2 = vsub.f32 %v3297_v4, %v3314_v32  ;;  %v8429_v44 = vsub.f32 %v3300_v54, %v3323_v17  ;;  %v3347_v4 = vand.u32 4294901760, %v8534_v45  ;;  %v3458_v32 = vand.u32 4294901760, %v3457_v60  ;;  %v3309_v54 = vld [vmem:[%s8795_s2 + $0x60] sm:$0xff] }
 0x6eb   :  { %7014 = vmatprep.subr.bf16.mxu0 %v7234_v0  ;;  %7044 = vmatprep.subr.bf16.mxu1 %v7234_v0 }
 0x6ec   :  { %v8554_v51 = vsub.f32 %v8534_v45, %v3347_v4 }
 0x6ee   :  { %7016 = vmatpush3.bf16.msra.mxu0 %v8000_v56  ;;  %7046 = vmatpush3.bf16.msra.mxu1 %v7710_v42  ;;  %v8411_v42 = vsub.f32 %v3298_v6, %v3317_v55  ;;  %v8434_v56 = vld [vmem:[%s8795_s2 + $0x20] sm:$0xff]  ;;  %v3451_v6 = vand.u32 4294901760, %v3450_v43  ;;  %v8542_v55 = vpack.c.bf16 %v3323_v17, %v3320_v46  ;;  %v3310_v46 = vld [vmem:[%s8795_s2 + $0x68] sm:$0xff] }
 0x6ef   :  { %7017 = vmatprep.subr.bf16.mxu0 %v7234_v0  ;;  %7047 = vmatprep.subr.bf16.mxu1 %v7234_v0 }
 0x6f2   :  { %7019 = vmatpush3.bf16.msra.mxu0 %v8008_v62  ;;  %7049 = vmatpush3.bf16.msra.mxu1 %v7722_v15  ;;  %v3407_v15 = vand.u32 4294901760, %v8409_v2  ;;  %v8439_v62 = vld [vmem:[%s8795_s2 + $0x28] sm:$0xff] }
 0x6f3   :  { %7020 = vmatprep.subr.bf16.mxu0 %v7234_v0  ;;  %7050 = vmatprep.subr.bf16.mxu1 %v7234_v0  ;;  %v3329_v58 = vand.u32 4294901760, %v8439_v62 }
 0x6f4   :  { %v3408_v29 = vsub.f32 %v8409_v2, %v3407_v15 }
 0x6f5   :  { %v8460_v33 = vsub.f32 %v8439_v62, %v3329_v58  ;;  %v3312_v62 = vld [vmem:[%s8795_s2 + $0x78] sm:$0xff] }
 0x6f6   :  { %7022 = vmatpush3.bf16.msra.mxu0 %v8016_v12  ;;  %7052 = vmatpush3.bf16.msra.mxu1 %v7728_v59  ;;  %v3414_v59 = vand.u32 4294901760, %v8411_v42  ;;  %v3409_v38 = vand.u32 4294901760, %v3408_v29  ;;  %v3421_v12 = vand.u32 4294901760, %v8427_v57  ;;  %v3464_v29 = vsub.f32 %v8512_v25, %v3463_v53 }
 0x6f7   :  { %7023 = vmatprep.subr.bf16.mxu0 %v7234_v0  ;;  %7077 = vmatprep.subr.bf16.mxu1 %v7234_v0  ;;  %v3442_v34 = vand.u32 4294901760, %v8460_v33  ;;  %v3359_v60 = vand.u32 4294901760, %v3312_v62 }
 0x6f8   :  { %v3415_v8 = vsub.f32 %v8411_v42, %v3414_v59  ;;  %v3422_v41 = vsub.f32 %v8427_v57, %v3421_v12  ;;  %v3465_v17 = vand.u32 4294901760, %v3464_v29 }
 0x6f9   :  { %6091 = vmatmul.mubr.f32.vlgmr.msra.gmra.mrb[34].mxu1 %v8321_v61  ;;  %v3443_v10 = vsub.f32 %v8460_v33, %v3442_v34 }
 0x6fa   :  { %7025 = vmatpush3.bf16.msra.mxu0 %v8024_v27  ;;  %6160 = vmatprep.mubr.msk.f32.mxu1 %vm7235_vm0, %v7236_v3  ;;  %v3416_v39 = vand.u32 4294901760, %v3415_v8  ;;  %v3428_v27 = vand.u32 4294901760, %v8429_v44  ;;  %v3423_v35 = vand.u32 4294901760, %v3422_v41  ;;  %v3471_v8 = vsub.f32 %v8517_v16, %v3470_v24 }
 0x6fb   :  { %7026 = vmatprep.subr.bf16.mxu0 %v7234_v0  ;;  %v3444_v13 = vand.u32 4294901760, %v3443_v10 }
 0x6fc   :  { %v7078_v40 = vpack.c.bf16 %v3416_v39, %v3409_v38  ;;  %v3429_v1 = vsub.f32 %v8429_v44, %v3428_v27  ;;  %v7087_v39 = vpack.c.bf16 %v3458_v32, %v3451_v6  ;;  %v8598_v6 = vpack.c.bf16 %v3335_v52, %v3332_v36 }
 0x6fe   :  { %7028 = vmatpush3.bf16.msra.mxu0 %v8032_v31  ;;  %7079 = vmatpush3.bf16.msra.mxu1 %v7078_v40  ;;  %v3326_v31 = vand.u32 4294901760, %v8434_v56  ;;  %v3430_v22 = vand.u32 4294901760, %v3429_v1  ;;  %v3472_v40 = vand.u32 4294901760, %v3471_v8  ;;  %v3350_v1 = vand.u32 4294901760, %v3309_v54 }
 0x6ff   :  { %7053 = vmatprep.subr.bf16.mxu0 %v7234_v0  ;;  %7080 = vmatprep.subr.bf16.mxu1 %v7234_v0  ;;  %v8605_v8 = vsub.f32 %v3312_v62, %v3359_v60 }
 0x700   :  { %v8455_v9 = vsub.f32 %v8434_v56, %v3326_v31  ;;  %v7081_v30 = vpack.c.bf16 %v3430_v22, %v3423_v35  ;;  %v8808_v35 = vand.u32 4294901760, %v8554_v51  ;;  %v3353_v22 = vand.u32 4294901760, %v3310_v46  ;;  %v3311_v56 = vld [vmem:[%s8795_s2 + $0x70] sm:$0xff] }
 0x701   :  { %6056 = vmatmul.mubr.f32.vlgmr.msra.gmra.mrb[12].mxu0 %v8321_v61  ;;  %v8529_v61 = vld [vmem:[%s8795_s2 + $0x50] sm:$0xff]  ;;  %v3356_v43 = vand.u32 4294901760, %v3311_v56  ;;  %v8804_v52 = vand.u32 4294901760, %v8605_v8 }
 0x702   :  { %6125 = vmatprep.mubr.msk.f32.mxu0 %vm7235_vm0, %v7236_v3  ;;  %v3435_v21 = vand.u32 4294901760, %v8455_v9  ;;  %7082 = vmatpush3.bf16.msra.mxu1 %v7081_v30  ;;  %v3344_v23 = vand.u32 4294901760, %v8529_v61  ;;  %v8571_v30 = vpack.c.bf16 %v3329_v58, %v3326_v31 }
 0x703   :  { %7083 = vmatprep.subr.bf16.mxu1 %v7234_v0  ;;  %7055 = vmatpush3.bf16.msra.mxu0 %v8505_v49  ;;  %v8603_v29 = vsub.f32 %v3311_v56, %v3356_v43  ;;  %v3513_v37 = vsub.f32 %v8605_v8, %v8804_v52  ;;  %v7114_v56 = vpack.c.bf16 %v8517_v16, %v8512_v25 }
 0x704   :  { %v3436_v47 = vsub.f32 %v8455_v9, %v3435_v21  ;;  %7056 = vmatprep.subr.bf16.mxu0 %v7234_v0  ;;  %v8551_v38 = vsub.f32 %v8529_v61, %v3344_v23  ;;  %v8628_v26 = vpack.c.bf16 %v3347_v4, %v3344_v23  ;;  %v8639_v23 = vpack.c.bf16 %v3359_v60, %v3356_v43 }
 0x705   :  { %v8805_v36 = vand.u32 4294901760, %v8603_v29  ;;  %v7102_v4 = vpack.c.bf16 %v8411_v42, %v8409_v2  ;;  %v7123_v43 = vpack.c.bf16 %v8605_v8, %v8603_v29  ;;  %v7156_v2 = vpack.c.bf16 %v3442_v34, %v3435_v21 }
 0x706   :  { %v3437_v63 = vand.u32 4294901760, %v3436_v47  ;;  %v8809_v41 = vand.u32 4294901760, %v8551_v38  ;;  %v7090_v47 = vpack.c.bf16 %v3472_v40, %v3465_v17  ;;  %v3514_v40 = vand.u32 4294901760, %v3513_v37 }
 0x707   :  { %7058 = vmatpush3.bf16.msra.mxu0 %v8542_v55  ;;  %v3506_v17 = vsub.f32 %v8603_v29, %v8805_v36  ;;  %v7117_v62 = vpack.c.bf16 %v8554_v51, %v8551_v38 }
 0x708   :  { %v7084_v7 = vpack.c.bf16 %v3444_v13, %v3437_v63  ;;  %7059 = vmatprep.subr.bf16.mxu0 %v7234_v0  ;;  %v3478_v10 = vsub.f32 %v8551_v38, %v8809_v41  ;;  %v8576_v63 = vsub.f32 %v3309_v54, %v3350_v1  ;;  %v3485_v13 = vsub.f32 %v8554_v51, %v8808_v35 }
 0x709   :  { %v3507_v18 = vand.u32 4294901760, %v3506_v17 }
 0x70a   :  { %7085 = vmatpush3.bf16.msra.mxu1 %v7084_v7  ;;  %v8581_v7 = vsub.f32 %v3310_v46, %v3353_v22  ;;  %v3479_v31 = vand.u32 4294901760, %v3478_v10  ;;  %v8807_v58 = vand.u32 4294901760, %v8576_v63  ;;  %v3486_v61 = vand.u32 4294901760, %v3485_v13 }
 0x70b   :  { %7086 = vmatprep.subr.bf16.mxu1 %v7234_v0  ;;  %7061 = vmatpush3.bf16.msra.mxu0 %v8571_v30  ;;  %v8633_v10 = vpack.c.bf16 %v3353_v22, %v3350_v1  ;;  %v7105_v1 = vpack.c.bf16 %v8429_v44, %v8427_v57  ;;  %v7108_v22 = vpack.c.bf16 %v8460_v33, %v8455_v9  ;;  %v8817_v21 = vand.u32 4294901760, %v8576_v63 }
 0x70c   :  { %7062 = vmatprep.subr.bf16.mxu0 %v7234_v0  ;;  %v8806_v45 = vand.u32 4294901760, %v8581_v7  ;;  %v3492_v32 = vsub.f32 %v8576_v63, %v8807_v58  ;;  %v7111_v13 = vpack.c.bf16 %v8490_v14, %v8485_v20  ;;  %v7162_v57 = vpack.c.bf16 %v3470_v24, %v3463_v53 }
 0x70d   :  { %v8818_v34 = vand.u32 4294901760, %v8581_v7 }
 0x70e   :  { %7088 = vmatpush3.bf16.msra.mxu1 %v7087_v39  ;;  %v7093_v39 = vpack.c.bf16 %v3486_v61, %v3479_v31  ;;  %v3499_v54 = vsub.f32 %v8581_v7, %v8806_v45  ;;  %v3493_v48 = vand.u32 4294901760, %v3492_v32  ;;  %v7120_v31 = vpack.c.bf16 %v8581_v7, %v8576_v63 }
 0x70f   :  { %7089 = vmatprep.subr.bf16.mxu1 %v7234_v0  ;;  %7064 = vmatpush3.bf16.msra.mxu0 %v8598_v6  ;;  %v7168_v20 = vpack.c.bf16 %v8818_v34, %v8817_v21 }
 0x710   :  { %7065 = vmatprep.subr.bf16.mxu0 %v7234_v0  ;;  %v3500_v46 = vand.u32 4294901760, %v3499_v54 }
 0x712   :  { %7091 = vmatpush3.bf16.msra.mxu1 %v7090_v47  ;;  %v7096_v28 = vpack.c.bf16 %v3500_v46, %v3493_v48  ;;  %v7099_v47 = vpack.c.bf16 %v3514_v40, %v3507_v18 }
 0x713   :  { %7092 = vmatprep.subr.bf16.mxu1 %v7234_v0  ;;  %7067 = vmatpush3.bf16.msra.mxu0 %v8615_v19 }
 0x714   :  { %7068 = vmatprep.subr.bf16.mxu0 %v7234_v0 }
 0x716   :  { %7094 = vmatpush3.bf16.msra.mxu1 %v7093_v39 }
 0x717   :  { %7095 = vmatprep.subr.bf16.mxu1 %v7234_v0  ;;  %7070 = vmatpush3.bf16.msra.mxu0 %v8628_v26 }
 0x718   :  { %7071 = vmatprep.subr.bf16.mxu0 %v7234_v0 }
 0x71a   :  { %7097 = vmatpush3.bf16.msra.mxu1 %v7096_v28 }
 0x71b   :  { %7098 = vmatprep.subr.bf16.mxu1 %v7234_v0  ;;  %7073 = vmatpush3.bf16.msra.mxu0 %v8633_v10 }
 0x71c   :  { %7074 = vmatprep.subr.bf16.mxu0 %v7234_v0 }
 0x71e   :  { %7100 = vmatpush3.bf16.msra.mxu1 %v7099_v47 }
 0x71f   :  { %7125 = vmatprep.subr.bf16.mxu1 %v7234_v0  ;;  %7076 = vmatpush3.bf16.msra.mxu0 %v8639_v23 }
 0x720   :  { %7101 = vmatprep.subr.bf16.mxu0 %v7234_v0 }
 0x78c   :  { %v2892_v60 = vpop.f32.mrb[30].mxu1 }
 0x78d   :  { %v5952_v61 = vpop.f32.mrb[31].mxu1 }
 0x794   :  { %v2741_v32 = vpop.f32.mrb[8].mxu0 }
 0x795   :  { %v2893_v39 = vadd.f32 %v2892_v60, %v2741_v32  ;;  %v5917_v54 = vpop.f32.mrb[9].mxu0 }
 0x7ac   :  { %v3085_v48 = vpop.f32.mrb[32].mxu1 }
 0x7ad   :  { %v6022_v46 = vpop.f32.mrb[33].mxu1 }
 0x7b4   :  { %v2996_v17 = vpop.f32.mrb[10].mxu0 }
 0x7b5   :  { %v2997_v37 = vadd.f32 %v2996_v17, %v2893_v39  ;;  %v5987_v28 = vpop.f32.mrb[11].mxu0 }
 0x7b7   :  { %v3086_v18 = vadd.f32 %v3085_v48, %v2997_v37 }
 0x7cc   :  { %v3291_v40 = vpop.f32.mrb[34].mxu1 }
 0x7cd   :  { %v6092_v47 = vpop.f32.mrb[35].mxu1 }
 0x7d4   :  { %v3204_v52 = vpop.f32.mrb[12].mxu0 }
 0x7d5   :  { %v3205_v36 = vadd.f32 %v3204_v52, %v3086_v18  ;;  %v6057_v45 = vpop.f32.mrb[13].mxu0 }
 0x7d7   :  { %v3292_v58 = vadd.f32 %v3291_v40, %v3205_v36  ;;  %v4418_v36 = vld [vmem:[%s8796_s5] ss:$0 sm:$0xff] }
 0x7d9   :  { %v3295_v35 = vadd.f32 %v3292_v58, %v8316_v11 }
 0x7db   :  { %7229 = vtanh.f32 %v3295_v35 }
 0x7e5   :  { %v7230_v41 = vpop.eup %7229 }
 0x7e6   :  { %v8660_v61 = vand.u32 4294901760, %v7230_v41  ;;  %v3956_v35 = vmul.f32 %v7230_v41, %v7230_v41 }
 0x7e8   :  { %6161 = vmatmul.mubr.f32.vlgmr.msra.gmra.mrb[36].mxu1 %v8660_v61  ;;  %v3395_v60 = vsub.f32 %v7230_v41, %v8660_v61  ;;  %v3957_v58 = vsub.f32 1.0, %v3956_v35 }
 0x7e9   :  { %7127 = vmatpush3.bf16.msra.mxu1 %v8505_v49  ;;  %6230 = vmatprep.mubr.msk.f32.mxu1 %vm7235_vm0, %v7236_v3 }
 0x7ea   :  { %7128 = vmatprep.subr.bf16.mxu1 %v7234_v0  ;;  %v3396_v52 = vand.u32 4294901760, %v3395_v60  ;;  %v3965_v41 = vmul.f32 %v4418_v36, %v3957_v58 }
 0x7ec   :  { %v3397_v45 = vsub.f32 %v3395_v60, %v3396_v52 }
 0x7ed   :  { %7130 = vmatpush3.bf16.msra.mxu1 %v8542_v55 }
 0x7ee   :  { %7131 = vmatprep.subr.bf16.mxu1 %v7234_v0  ;;  %v3398_v11 = vand.u32 4294901760, %v3397_v45 }
 0x7f0   :  { %6126 = vmatmul.mubr.f32.vlgmr.msra.gmra.mrb[14].mxu0 %v3398_v11 }
 0x7f1   :  { %7103 = vmatpush3.bf16.msra.mxu0 %v7102_v4  ;;  %7133 = vmatpush3.bf16.msra.mxu1 %v8571_v30  ;;  %v3966_v4 = vadd.f32 1.0, %v3965_v41 }
 0x7f2   :  { %7104 = vmatprep.subr.bf16.mxu0 %v7234_v0  ;;  %7134 = vmatprep.subr.bf16.mxu1 %v7234_v0 }
 0x7f3   :  { %6195 = vmatprep.mubr.msk.f32.mxu0 %vm7235_vm0, %v7236_v3 }
 0x7f5   :  { %7106 = vmatpush3.bf16.msra.mxu0 %v7105_v1  ;;  %7136 = vmatpush3.bf16.msra.mxu1 %v8598_v6  ;;  %v3967_v1 = vand.u32 2147483647, %v3966_v4 }
 0x7f6   :  { %7107 = vmatprep.subr.bf16.mxu0 %v7234_v0  ;;  %7137 = vmatprep.subr.bf16.mxu1 %v7234_v0 }
 0x7f7   :  { %7231 = vlog2.f32 %v3967_v1 }
 0x7f9   :  { %7109 = vmatpush3.bf16.msra.mxu0 %v7108_v22  ;;  %7139 = vmatpush3.bf16.msra.mxu1 %v8615_v19  ;;  %v7150_v22 = vpack.c.bf16 %v3414_v59, %v3407_v15  ;;  %v7159_v15 = vpack.c.bf16 %v3456_v5, %v3449_v50  ;;  %v8819_v50 = vand.u32 4294901760, %v8603_v29  ;;  %v8820_v5 = vand.u32 4294901760, %v8605_v8 }
 0x7fa   :  { %7110 = vmatprep.subr.bf16.mxu0 %v7234_v0  ;;  %7140 = vmatprep.subr.bf16.mxu1 %v7234_v0 }
 0x7fb   :  { %v7171_v25 = vpack.c.bf16 %v8820_v5, %v8819_v50 }
 0x7fd   :  { %7112 = vmatpush3.bf16.msra.mxu0 %v7111_v13  ;;  %7142 = vmatpush3.bf16.msra.mxu1 %v8628_v26 }
 0x7fe   :  { %7113 = vmatprep.subr.bf16.mxu0 %v7234_v0  ;;  %7143 = vmatprep.subr.bf16.mxu1 %v7234_v0 }
 0x801   :  { %7115 = vmatpush3.bf16.msra.mxu0 %v7114_v56  ;;  %7145 = vmatpush3.bf16.msra.mxu1 %v8633_v10  ;;  %v7232_v42 = vpop.eup %7231 }
 0x802   :  { %7116 = vmatprep.subr.bf16.mxu0 %v7234_v0  ;;  %7146 = vmatprep.subr.bf16.mxu1 %v7234_v0  ;;  %v3969_v59 = vmul.f32 0.6931472, %v7232_v42 }
 0x804   :  { %v3971_v44 = vand.u32 4294901760, %v3969_v59 }
 0x805   :  { %7118 = vmatpush3.bf16.msra.mxu0 %v7117_v62  ;;  %7148 = vmatpush3.bf16.msra.mxu1 %v8639_v23 }
 0x806   :  { %7119 = vmatprep.subr.bf16.mxu0 %v7234_v0  ;;  %7173 = vmatprep.subr.bf16.mxu1 %v7234_v0  ;;  %v4043_v33 = vsub.f32 %v3969_v59, %v3971_v44 }
 0x808   :  { %6231 = vmatmul.mubr.f32.vlgmr.msra.gmra.mrb[38].mxu1 %v3396_v52  ;;  %v4044_v14 = vand.u32 4294901760, %v4043_v33 }
 0x809   :  { %7121 = vmatpush3.bf16.msra.mxu0 %v7120_v31  ;;  %7175 = vmatpush3.bf16.msra.mxu1 %v8505_v49  ;;  %v7153_v49 = vpack.c.bf16 %v3428_v27, %v3421_v12  ;;  %v8815_v12 = vand.u32 4294901760, %v8551_v38  ;;  %v8816_v27 = vand.u32 4294901760, %v8554_v51 }
 0x80a   :  { %7122 = vmatprep.subr.bf16.mxu0 %v7234_v0  ;;  %7176 = vmatprep.subr.bf16.mxu1 %v7234_v0  ;;  %v4045_v16 = vsub.f32 %v4043_v33, %v4044_v14 }
 0x80b   :  { %6300 = vmatprep.mubr.msk.f32.mxu1 %vm7235_vm0, %v7236_v3  ;;  %v7165_v9 = vpack.c.bf16 %v8816_v27, %v8815_v12 }
 0x80c   :  { %v4046_v53 = vand.u32 4294901760, %v4045_v16 }
 0x80d   :  { %7124 = vmatpush3.bf16.msra.mxu0 %v7123_v43  ;;  %7178 = vmatpush3.bf16.msra.mxu1 %v8542_v55 }
 0x80e   :  { %7149 = vmatprep.subr.bf16.mxu0 %v7234_v0  ;;  %7179 = vmatprep.subr.bf16.mxu1 %v7234_v0 }
 0x810   :  { %6196 = vmatmul.mubr.f32.vlgmr.msra.gmra.mrb[16].mxu0 %v3395_v60 }
 0x811   :  { %7151 = vmatpush3.bf16.msra.mxu0 %v7150_v22  ;;  %7181 = vmatpush3.bf16.msra.mxu1 %v8571_v30 }
 0x812   :  { %7152 = vmatprep.subr.bf16.mxu0 %v7234_v0  ;;  %7182 = vmatprep.subr.bf16.mxu1 %v7234_v0 }
 0x813   :  { %6265 = vmatprep.mubr.msk.f32.mxu0 %vm7235_vm0, %v7236_v3 }
 0x815   :  { %7154 = vmatpush3.bf16.msra.mxu0 %v7153_v49  ;;  %7184 = vmatpush3.bf16.msra.mxu1 %v8598_v6 }
 0x816   :  { %7155 = vmatprep.subr.bf16.mxu0 %v7234_v0  ;;  %7185 = vmatprep.subr.bf16.mxu1 %v7234_v0 }
 0x819   :  { %7157 = vmatpush3.bf16.msra.mxu0 %v7156_v2  ;;  %7187 = vmatpush3.bf16.msra.mxu1 %v8615_v19 }
 0x81a   :  { %7158 = vmatprep.subr.bf16.mxu0 %v7234_v0  ;;  %7188 = vmatprep.subr.bf16.mxu1 %v7234_v0 }
 0x81d   :  { %7160 = vmatpush3.bf16.msra.mxu0 %v7159_v15  ;;  %7190 = vmatpush3.bf16.msra.mxu1 %v8628_v26 }
 0x81e   :  { %7161 = vmatprep.subr.bf16.mxu0 %v7234_v0  ;;  %7191 = vmatprep.subr.bf16.mxu1 %v7234_v0 }
 0x821   :  { %7163 = vmatpush3.bf16.msra.mxu0 %v7162_v57  ;;  %7193 = vmatpush3.bf16.msra.mxu1 %v8633_v10 }
 0x822   :  { %7164 = vmatprep.subr.bf16.mxu0 %v7234_v0  ;;  %7194 = vmatprep.subr.bf16.mxu1 %v7234_v0 }
 0x825   :  { %7166 = vmatpush3.bf16.msra.mxu0 %v7165_v9  ;;  %7196 = vmatpush3.bf16.msra.mxu1 %v8639_v23 }
 0x826   :  { %7167 = vmatprep.subr.bf16.mxu0 %v7234_v0  ;;  %6303 = vmatprep.subr.mxu1 %v7236_v3 }
 0x828   :  { %6301 = vmatmul.mubr.f32.vlgmr.msra.gmra.mrb[40].mxu1 %v8660_v61 }
 0x829   :  { %7169 = vmatpush3.bf16.msra.mxu0 %v7168_v20  ;;  %6305 = vmatprep.mubr.msk.f32.mxu1 %vm7235_vm0, %v7236_v3 }
 0x82a   :  { %7170 = vmatprep.subr.bf16.mxu0 %v7234_v0  ;;  %v7237_v0 = vmov 1.0  }
 0x82d   :  { %7172 = vmatpush3.bf16.msra.mxu0 %v7171_v25 }
 0x82e   :  { %6304 = vmatpush3.xpose.msra.mxu1 %v3971_v44  ;;  %6318 = vmatprep.subr.mxu0 %v7236_v3 }
 0x82f   :  { %6308 = vmatprep.subr.mxu1 %v7236_v3 }
 0x830   :  { %6266 = vmatmul.mubr.f32.vlgmr.msra.gmra.mrb[18].mxu0 %v8660_v61 }
 0x831   :  { %6306 = vmatmul.mubr.f32.vlgmr.msra.gmra.mrb[42].mxu1 %v7236_v3  ;;  %6320 = vmatprep.mubr.msk.f32.mxu0 %vm7235_vm0, %v7236_v3 }
 0x832   :  { %6309 = vmatpush3.xpose.msra.mxu1 %v4046_v53  ;;  %6310 = vmatprep.mubr.msk.f32.mxu1 %vm7235_vm0, %v7236_v3 }
 0x833   :  { %6313 = vmatprep.subr.mxu1 %v7236_v3 }
 0x836   :  { %6319 = vmatpush3.xpose.msra.mxu0 %v3971_v44 }
 0x837   :  { %6323 = vmatprep.subr.mxu0 %v7236_v3 }
 0x839   :  { %6311 = vmatmul.mubr.f32.vlgmr.msra.gmra.mrb[42].mxu1 %v7237_v0  ;;  %6321 = vmatmul.mubr.f32.vlgmr.msra.gmra.mrb[20].mxu0 %v7236_v3 }
 0x83a   :  { %6314 = vmatpush3.xpose.msra.mxu1 %v4043_v33  ;;  %6324 = vmatpush3.xpose.msra.mxu0 %v4044_v14 }
 0x83b   :  { %6315 = vmatprep.mubr.msk.f32.mxu1 %vm7235_vm0, %v7236_v3  ;;  %6325 = vmatprep.mubr.msk.f32.mxu0 %vm7235_vm0, %v7236_v3 }
 0x83c   :  { %6328 = vmatprep.subr.mxu0 %v7236_v3 }
 0x841   :  { %6316 = vmatmul.mubr.f32.vlgmr.msra.gmra.mrb[42].mxu1 %v7236_v3  ;;  %6326 = vmatmul.mubr.f32.vlgmr.msra.gmra.mrb[20].mxu0 %v7237_v0 }
 0x842   :  { %6329 = vmatpush3.xpose.msra.mxu0 %v3971_v44  ;;  %6330 = vmatprep.mubr.msk.f32.mxu0 %vm7235_vm0, %v7236_v3  ;;  %v7233_v3 = vld [vmem:[%s8792_s0] sm:$0xff] }
 0x849   :  { %6331 = vmatmul.mubr.f32.vlgmr.msra.gmra.mrb[20].mxu0 %v7237_v0 }
 0x8bb   :  { %v3551_v24 = vpop.f32.mrb[36].mxu1 }
 0x8bc   :  { %v6162_v55 = vpop.f32.mrb[37].mxu1 }
 0x8c3   :  { %v3400_v38 = vpop.f32.mrb[14].mxu0 }
 0x8c4   :  { %v3552_v51 = vadd.f32 %v3551_v24, %v3400_v38  ;;  %v6127_v30 = vpop.f32.mrb[15].mxu0 }
 0x8db   :  { %v3744_v63 = vpop.f32.mrb[38].mxu1 }
 0x8dc   :  { %v6232_v7 = vpop.f32.mrb[39].mxu1 }
 0x8e3   :  { %v3655_v6 = vpop.f32.mrb[16].mxu0 }
 0x8e4   :  { %v3656_v29 = vadd.f32 %v3655_v6, %v3552_v51  ;;  %v6197_v8 = vpop.f32.mrb[17].mxu0 }
 0x8e6   :  { %v3745_v19 = vadd.f32 %v3744_v63, %v3656_v29 }
 0x8fb   :  { %v3950_v26 = vpop.f32.mrb[40].mxu1 }
 0x8fc   :  { %v6302_v10 = vpop.f32.mrb[41].mxu1 }
 0x903   :  { %v3863_v23 = vpop.f32.mrb[18].mxu0 }
 0x904   :  { %v3864_v13 = vadd.f32 %v3863_v23, %v3745_v19  ;;  %v6267_v56 = vpop.f32.mrb[19].mxu0 }
 0x906   :  { %v3951_v62 = vadd.f32 %v3950_v26, %v3864_v13 }
 0x908   :  { %v3954_v31 = vadd.f32 %v7233_v3, %v3951_v62 }
 0x90a   :  { %3955 = vst [vmem:[%s8797_s6] sm:$0xff] %v3954_v31 }
 0x914   :  { %v4184_v43 = vpop.f32.mrb[42].mxu1 }
 0x915   :  { %v6317_v32 = vpop.f32.mrb[43].mxu1 }
 0x91c   :  { %v4399_v39 = vpop.f32.mrb[20].mxu0 }
 0x91d   :  { %v7198_v54 = vadd.f32 %v4399_v39, %v4184_v43  ;;  %v6332_v48 = vpop.f32.mrb[21].mxu0 }
 0x91f   :  { %4404 = vst.msk [vmem:[%s8798_s7] sm:$0xff] %vm4403_vm5, %v7198_v54 }

</bundles_post_ra>
